<compile_context>
chip_gen: v6e
topology: v6e:2x2x1
jax: 0.10.0
libtpu: 0.0.40
codegen_flags: <defaults>
</compile_context>

<pallas_src>
import math

import jax
import jax.numpy as jnp
import numpy as np
from jax.experimental import pallas as pl
from jax.experimental.pallas import tpu as pltpu

VMEM = pltpu.MemorySpace.VMEM


# ----------------------------- shared math ---------------------------------

def _adjusted_cosine(x):
    """similarity_matrix() core on a 2-D (N, F) array (exact f32 division)."""
    xc = x - jnp.mean(x, axis=1, keepdims=True)
    nrm = jnp.sqrt(jnp.sum(xc * xc, axis=1, keepdims=True))
    xn = xc / (1e-8 + nrm)
    r = jnp.dot(xn, xn.T, preferred_element_type=jnp.float32)
    return jnp.clip(r, -1.0, 1.0)


# ----------------------------- fused kernel --------------------------------

def predsim_fused_kernel(hpad_ref, wblk_ref, feats_ref, weff_ref, decb_ref,
                         yoh_ref, ry_ref, loss_ref):
    """Whole PredSimLoss.forward in a single VMEM-resident kernel.

    hpad_ref:  (H+2, W+2, N*C)  f32   zero-halo padded activation, lane-dense
    wblk_ref:  (9*N*C, N*C)     bf16  per-tap block-diag conv weight kron(I_N, w)
    feats_ref: (N, C*H*W)       f32   NCHW-flattened activation (decoder path)
    weff_ref:  (C*H*W, Kpad)    bf16  decoder weight with avg-pool folded in
    decb_ref:  (1, Kpad)        f32   decoder bias (padded cols = -1e30)
    yoh_ref:   (N, Kpad)        f32   one-hot labels (padded cols = 0)
    ry_ref:    (N, N)           f32   similarity_matrix(one_hot(y)) (detached)
    loss_ref:  (1, 1)           f32   scalar loss output
    """
    Hp, Wp, NC = hpad_ref.shape
    H, W = Hp - 2, Wp - 2
    HW = H * W
    N = ry_ref.shape[0]
    C = NC // N
    mxu_dtype = wblk_ref.dtype

    # ---- 3x3 'same' conv: 9 accumulated lane-dense matmuls ----------------
    # Rows k*NC:(k+1)*NC of wblk hold kron(I_N, w[kh, kw]) for tap k = 3*kh+kw.
    acc = jnp.zeros((HW, NC), jnp.float32)
    for k in range(9):
        kh, kw = divmod(k, 3)
        tap = hpad_ref[kh:kh + H, kw:kw + W, :].reshape(HW, NC)
        acc = acc + jnp.dot(tap.astype(mxu_dtype),
                            wblk_ref[k * NC:(k + 1) * NC, :],
                            preferred_element_type=jnp.float32)

    # ---- Rh = similarity_matrix(h_loss): unbiased std over spatial --------
    mu = jnp.mean(acc, axis=0, keepdims=True)                        # (1, NC)
    var = jnp.sum((acc - mu) ** 2, axis=0, keepdims=True) / (HW - 1)  # torch.std
    stdf = jnp.sqrt(var)                                             # (1, NC)
    std = jnp.concatenate(
        [stdf[:, n * C:(n + 1) * C] for n in range(N)], axis=0)      # (N, C)
    rh = _adjusted_cosine(std)                                       # (N, N)

    # ---- decoder (avg-pool folded into W_eff) + cross-entropy -------------
    logits = jnp.dot(feats_ref[...].astype(mxu_dtype), weff_ref[...],
                     preferred_element_type=jnp.float32) + decb_ref[...]
    # Padded class columns: weight 0, bias -1e30, one-hot 0.  In f32,
    # exp(-1e30 - max) underflows to exactly 0 and 0 * (-1e30) = -0.0, so both
    # the log-sum-exp and the target term ignore them.  Do NOT switch the pad
    # bias to -inf or drop logits below f32 precision.
    mx = jnp.max(logits, axis=1, keepdims=True)
    lse = mx + jnp.log(jnp.sum(jnp.exp(logits - mx), axis=1, keepdims=True))
    tgt = jnp.sum(yoh_ref[...] * logits, axis=1, keepdims=True)
    ce = jnp.mean(lse - tgt, axis=0, keepdims=True)                  # (1, 1)

    # ---- loss = (1 - 0.99) * CE + 0.99 * MSE(Rh, Ry) ------------------------
    diff = rh - ry_ref[...]
    mse = jnp.sum(jnp.sum(diff * diff, axis=1, keepdims=True),
                  axis=0, keepdims=True) / (N * N)                   # (1, 1)
    loss_ref[...] = (1.0 - 0.99) * ce + 0.99 * mse


# ----------------------------- module ---------------------------------------

class PredSimLossPallas:
    """Pallas port of PredSimLoss.forward (parameters initialized in-script)."""

    def __init__(self, key, temperature=0.1, input_neurons=256, c_in=16,
                 shape=8, num_classes=200, mxu_dtype=jnp.bfloat16):
        self.num_classes = num_classes
        self.k_pad = ((num_classes + 127) // 128) * 128      # lane-dense classes
        self.mxu_dtype = mxu_dtype
        self.c_in = c_in
        self.shape = shape
        k1, k2, k3 = jax.random.split(key, 3)

        # conv_loss: Conv2d(c_in, c_in, 3, padding=1, bias=False), HWIO layout.
        bound = 1.0 / math.sqrt(c_in * 9)
        self.conv_w = jax.random.uniform(k1, (3, 3, c_in, c_in),
                                         jnp.float32, -bound, bound)

        # Average-pool configuration (mirrors the PyTorch __init__ loop).
        ks_h, ks_w = 1, 1
        dim_out_h, dim_out_w = shape, shape
        dim_in_decoder = c_in * dim_out_h * dim_out_w
        while dim_in_decoder > input_neurons and ks_h < shape:
            ks_h *= 2
            dim_out_h = math.ceil(shape / ks_h)
            dim_in_decoder = c_in * dim_out_h * dim_out_w
            if dim_in_decoder > input_neurons:
                ks_w *= 2
                dim_out_w = math.ceil(shape / ks_w)
                dim_in_decoder = c_in * dim_out_h * dim_out_w
        oh, ow = shape // ks_h, shape // ks_w                 # AvgPool2d, pad=0
        assert c_in * oh * ow == input_neurons, \
            "pooled feature size must match the decoder input"

        # Pooling matrix P: (oh*ow, H*W), entries 1/(ks_h*ks_w) on window taps.
        P = np.zeros((oh * ow, shape * shape), np.float32)
        for i in range(oh):
            for j in range(ow):
                for a in range(ks_h):
                    for b in range(ks_w):
                        P[i * ow + j, (i * ks_h + a) * shape + (j * ks_w + b)] = \
                            1.0 / (ks_h * ks_w)

        # decoder_y: Linear(input_neurons, num_classes).  Feature ordering is
        # PyTorch's (channel, pooled-spatial) flatten; weights are initialized
        # in-script, so the ordering only has to be self-consistent.
        bl = 1.0 / math.sqrt(input_neurons)
        dec_w = jax.random.uniform(k2, (c_in, oh * ow, num_classes),
                                   jnp.float32, -bl, bl)
        dec_b = jax.random.uniform(k3, (num_classes,), jnp.float32, -bl, bl)

        # Fold the avg-pool into the decoder weight:
        #   W_eff[(c, s), k] = sum_o P[o, s] * dec_w[c, o, k]
        w_eff = jnp.einsum('os,cok->csk', jnp.asarray(P), dec_w)
        w_eff = w_eff.reshape(c_in * shape * shape, num_classes)
        self.w_eff = jnp.concatenate(
            [w_eff, jnp.zeros((w_eff.shape[0], self.k_pad - num_classes),
                              jnp.float32)], axis=1).astype(mxu_dtype)
        # Padded class columns get bias -1e30 (not -inf; see kernel comment).
        self.dec_b_pad = jnp.concatenate(
            [dec_b, jnp.full((self.k_pad - num_classes,), -1e30, jnp.float32)]
        ).reshape(1, self.k_pad)

    def __call__(self, h_nchw, y):
        N, C, H, W = h_nchw.shape
        # similarity_matrix std branch requires C > 3 and H > 1.
        # TODO(synk): the flatten branch (C <= 3 or H == 1) is not implemented.
        assert C > 3 and H > 1
        assert C == self.c_in and H == self.shape and W == self.shape
        NC = N * C
        hw = H * W

        # XLA-side glue: one transpose to the lane-dense (H, W, N*C) layout,
        # a 1-pixel zero halo (so the kernel never zero-fills its hot buffer),
        # and the zero-cost NCHW flatten for the decoder path.
        h_hwnc = jnp.transpose(h_nchw, (2, 3, 0, 1)).reshape(H, W, NC)
        h_pad = jnp.pad(h_hwnc, ((1, 1), (1, 1), (0, 0)))
        feats = h_nchw.reshape(N, C * hw)

        # Labels: Ry is label-only and detached in the reference -> XLA side.
        yoh = jax.nn.one_hot(y, self.num_classes, dtype=jnp.float32)
        ry = _adjusted_cosine(yoh)                                   # (N, N)
        yoh_pad = jnp.pad(yoh, ((0, 0), (0, self.k_pad - self.num_classes)))

        # Per-tap block-diagonal conv weight kron(I_N, w_tap); rows (tap, n, ci).
        # Constant-folded under jit (conv_w is a captured constant).
        w9 = self.conv_w.reshape(9, C, C)
        eye = jnp.eye(N, dtype=jnp.float32)
        wblk = jnp.einsum('nm,kio->knimo', eye, w9).reshape(
            9 * NC, NC).astype(self.mxu_dtype)

        flops = (2 * hw * 9 * NC * NC            # conv matmuls
                 + 2 * N * (C * hw) * self.k_pad  # decoder matmul
                 + 4 * N * N * C)                 # similarity matmuls
        transcendentals = N * self.k_pad + NC + 2 * N
        bytes_accessed = (h_pad.size * 4 + wblk.size * 2 + feats.size * 4 +
                          self.w_eff.size * 2 + self.dec_b_pad.size * 4 +
                          yoh_pad.size * 4 + ry.size * 4 + 4)

        # TODO(synk): if this loss is evaluated for many layers / micro-batches
        # per step (or N/C/H/W grow), add a leading "parallel" grid axis (2 TCs
        # on v7x) and grid tiling + an explicit vmem_limit_bytes instead of the
        # whole-array VMEM specs (v7x physical VMEM is 64 MiB).
        loss = pl.pallas_call(
            predsim_fused_kernel,
            out_shape=jax.ShapeDtypeStruct((1, 1), jnp.float32),
            in_specs=[pl.BlockSpec(memory_space=VMEM)] * 7,
            out_specs=pl.BlockSpec(memory_space=VMEM),
            cost_estimate=pl.CostEstimate(
                flops=int(flops),
                transcendentals=int(transcendentals),
                bytes_accessed=int(bytes_accessed)),
        )(h_pad, wblk, feats, self.w_eff, self.dec_b_pad, yoh_pad, ry)
        return loss[0, 0]


# ----------------------------- demo -----------------------------------------

if __name__ == "__main__":
    key = jax.random.PRNGKey(0)
    k_param, k_h, k_y = jax.random.split(key, 3)

    # Small config consistent with the module: batch=8, c_in=16, spatial=8,
    # input_neurons=256 (-> AvgPool2d((2, 2)) and Linear(256, 200)); N*C = 128
    # makes the activation layout exactly lane-dense.
    N, C, S = 8, 16, 8
    model = PredSimLossPallas(k_param, input_neurons=256, c_in=C, shape=S)

    h = jax.random.normal(k_h, (N, C, S, S), dtype=jnp.float32)
    y = jax.random.randint(k_y, (N,), 0, 200)

    loss = jax.jit(model.__call__)(h, y)
    jax.block_until_ready(loss)
    assert bool(jnp.isfinite(loss))
    print("KERNEL_OK")
</pallas_src>

<mosaic_0001>
module attributes {stable_mosaic.version = 11 : i64} {
  func.func @predsim_fused_kernel(%arg0: memref<10x10x128xf32, #tpu.memory_space<vmem>>, %arg1: memref<1152x128xbf16, #tpu.memory_space<vmem>>, %arg2: memref<8x1024xf32, #tpu.memory_space<vmem>>, %arg3: memref<1024x256xbf16, #tpu.memory_space<vmem>>, %arg4: memref<1x256xf32, #tpu.memory_space<vmem>>, %arg5: memref<8x256xf32, #tpu.memory_space<vmem>>, %arg6: memref<8x8xf32, #tpu.memory_space<vmem>>, %arg7: memref<1x1xf32, #tpu.memory_space<vmem>>) attributes {dimension_semantics = [], scalar_prefetch = 0 : i64, scratch_operands = 0 : i64, tpu.core_type = #tpu.core_type<tc>} {
    %cst = arith.constant 0.000000e+00 : f32
    %0 = vector.broadcast %cst : f32 to vector<64x128xf32>
    %c0 = arith.constant 0 : index
    %c0_0 = arith.constant 0 : index
    %c0_1 = arith.constant 0 : index
    %1 = vector.load %arg0[%c0, %c0_0, %c0_1] : memref<10x10x128xf32, #tpu.memory_space<vmem>>, vector<8x8x128xf32>
    %2 = vector.shape_cast %1 : vector<8x8x128xf32> to vector<64x128xf32>
    %3 = arith.truncf %2 : vector<64x128xf32> to vector<64x128xbf16>
    %c0_2 = arith.constant 0 : index
    %c0_3 = arith.constant 0 : index
    %4 = vector.load %arg1[%c0_2, %c0_3] : memref<1152x128xbf16, #tpu.memory_space<vmem>>, vector<128x128xbf16>
    %cst_4 = arith.constant dense<0.000000e+00> : vector<64x128xf32>
    %5 = tpu.matmul %3, %4, %cst_4 {dimension_numbers = #tpu.dot_dimension_numbers<[1], [0], [0], [1], [0, 0, 1, 1], [], []>} : vector<64x128xbf16>, vector<128x128xbf16>, vector<64x128xf32> -> vector<64x128xf32>
    %6 = arith.addf %0, %5 : vector<64x128xf32>
    %c0_5 = arith.constant 0 : index
    %c1 = arith.constant 1 : index
    %c0_6 = arith.constant 0 : index
    %7 = vector.load %arg0[%c0_5, %c1, %c0_6] : memref<10x10x128xf32, #tpu.memory_space<vmem>>, vector<8x8x128xf32>
    %8 = vector.shape_cast %7 : vector<8x8x128xf32> to vector<64x128xf32>
    %9 = arith.truncf %8 : vector<64x128xf32> to vector<64x128xbf16>
    %c128 = arith.constant 128 : index
    %c0_7 = arith.constant 0 : index
    %10 = vector.load %arg1[%c128, %c0_7] : memref<1152x128xbf16, #tpu.memory_space<vmem>>, vector<128x128xbf16>
    %cst_8 = arith.constant dense<0.000000e+00> : vector<64x128xf32>
    %11 = tpu.matmul %9, %10, %cst_8 {dimension_numbers = #tpu.dot_dimension_numbers<[1], [0], [0], [1], [0, 0, 1, 1], [], []>} : vector<64x128xbf16>, vector<128x128xbf16>, vector<64x128xf32> -> vector<64x128xf32>
    %12 = arith.addf %6, %11 : vector<64x128xf32>
    %c0_9 = arith.constant 0 : index
    %c2 = arith.constant 2 : index
    %c0_10 = arith.constant 0 : index
    %13 = vector.load %arg0[%c0_9, %c2, %c0_10] : memref<10x10x128xf32, #tpu.memory_space<vmem>>, vector<8x8x128xf32>
    %14 = vector.shape_cast %13 : vector<8x8x128xf32> to vector<64x128xf32>
    %15 = arith.truncf %14 : vector<64x128xf32> to vector<64x128xbf16>
    %c256 = arith.constant 256 : index
    %c0_11 = arith.constant 0 : index
    %16 = vector.load %arg1[%c256, %c0_11] : memref<1152x128xbf16, #tpu.memory_space<vmem>>, vector<128x128xbf16>
    %cst_12 = arith.constant dense<0.000000e+00> : vector<64x128xf32>
    %17 = tpu.matmul %15, %16, %cst_12 {dimension_numbers = #tpu.dot_dimension_numbers<[1], [0], [0], [1], [0, 0, 1, 1], [], []>} : vector<64x128xbf16>, vector<128x128xbf16>, vector<64x128xf32> -> vector<64x128xf32>
    %18 = arith.addf %12, %17 : vector<64x128xf32>
    %c1_13 = arith.constant 1 : index
    %c0_14 = arith.constant 0 : index
    %c0_15 = arith.constant 0 : index
    %19 = vector.load %arg0[%c1_13, %c0_14, %c0_15] : memref<10x10x128xf32, #tpu.memory_space<vmem>>, vector<8x8x128xf32>
    %20 = vector.shape_cast %19 : vector<8x8x128xf32> to vector<64x128xf32>
    %21 = arith.truncf %20 : vector<64x128xf32> to vector<64x128xbf16>
    %c384 = arith.constant 384 : index
    %c0_16 = arith.constant 0 : index
    %22 = vector.load %arg1[%c384, %c0_16] : memref<1152x128xbf16, #tpu.memory_space<vmem>>, vector<128x128xbf16>
    %cst_17 = arith.constant dense<0.000000e+00> : vector<64x128xf32>
    %23 = tpu.matmul %21, %22, %cst_17 {dimension_numbers = #tpu.dot_dimension_numbers<[1], [0], [0], [1], [0, 0, 1, 1], [], []>} : vector<64x128xbf16>, vector<128x128xbf16>, vector<64x128xf32> -> vector<64x128xf32>
    %24 = arith.addf %18, %23 : vector<64x128xf32>
    %c1_18 = arith.constant 1 : index
    %c1_19 = arith.constant 1 : index
    %c0_20 = arith.constant 0 : index
    %25 = vector.load %arg0[%c1_18, %c1_19, %c0_20] : memref<10x10x128xf32, #tpu.memory_space<vmem>>, vector<8x8x128xf32>
    %26 = vector.shape_cast %25 : vector<8x8x128xf32> to vector<64x128xf32>
    %27 = arith.truncf %26 : vector<64x128xf32> to vector<64x128xbf16>
    %c512 = arith.constant 512 : index
    %c0_21 = arith.constant 0 : index
    %28 = vector.load %arg1[%c512, %c0_21] : memref<1152x128xbf16, #tpu.memory_space<vmem>>, vector<128x128xbf16>
    %cst_22 = arith.constant dense<0.000000e+00> : vector<64x128xf32>
    %29 = tpu.matmul %27, %28, %cst_22 {dimension_numbers = #tpu.dot_dimension_numbers<[1], [0], [0], [1], [0, 0, 1, 1], [], []>} : vector<64x128xbf16>, vector<128x128xbf16>, vector<64x128xf32> -> vector<64x128xf32>
    %30 = arith.addf %24, %29 : vector<64x128xf32>
    %c1_23 = arith.constant 1 : index
    %c2_24 = arith.constant 2 : index
    %c0_25 = arith.constant 0 : index
    %31 = vector.load %arg0[%c1_23, %c2_24, %c0_25] : memref<10x10x128xf32, #tpu.memory_space<vmem>>, vector<8x8x128xf32>
    %32 = vector.shape_cast %31 : vector<8x8x128xf32> to vector<64x128xf32>
    %33 = arith.truncf %32 : vector<64x128xf32> to vector<64x128xbf16>
    %c640 = arith.constant 640 : index
    %c0_26 = arith.constant 0 : index
    %34 = vector.load %arg1[%c640, %c0_26] : memref<1152x128xbf16, #tpu.memory_space<vmem>>, vector<128x128xbf16>
    %cst_27 = arith.constant dense<0.000000e+00> : vector<64x128xf32>
    %35 = tpu.matmul %33, %34, %cst_27 {dimension_numbers = #tpu.dot_dimension_numbers<[1], [0], [0], [1], [0, 0, 1, 1], [], []>} : vector<64x128xbf16>, vector<128x128xbf16>, vector<64x128xf32> -> vector<64x128xf32>
    %36 = arith.addf %30, %35 : vector<64x128xf32>
    %c2_28 = arith.constant 2 : index
    %c0_29 = arith.constant 0 : index
    %c0_30 = arith.constant 0 : index
    %37 = vector.load %arg0[%c2_28, %c0_29, %c0_30] : memref<10x10x128xf32, #tpu.memory_space<vmem>>, vector<8x8x128xf32>
    %38 = vector.shape_cast %37 : vector<8x8x128xf32> to vector<64x128xf32>
    %39 = arith.truncf %38 : vector<64x128xf32> to vector<64x128xbf16>
    %c768 = arith.constant 768 : index
    %c0_31 = arith.constant 0 : index
    %40 = vector.load %arg1[%c768, %c0_31] : memref<1152x128xbf16, #tpu.memory_space<vmem>>, vector<128x128xbf16>
    %cst_32 = arith.constant dense<0.000000e+00> : vector<64x128xf32>
    %41 = tpu.matmul %39, %40, %cst_32 {dimension_numbers = #tpu.dot_dimension_numbers<[1], [0], [0], [1], [0, 0, 1, 1], [], []>} : vector<64x128xbf16>, vector<128x128xbf16>, vector<64x128xf32> -> vector<64x128xf32>
    %42 = arith.addf %36, %41 : vector<64x128xf32>
    %c2_33 = arith.constant 2 : index
    %c1_34 = arith.constant 1 : index
    %c0_35 = arith.constant 0 : index
    %43 = vector.load %arg0[%c2_33, %c1_34, %c0_35] : memref<10x10x128xf32, #tpu.memory_space<vmem>>, vector<8x8x128xf32>
    %44 = vector.shape_cast %43 : vector<8x8x128xf32> to vector<64x128xf32>
    %45 = arith.truncf %44 : vector<64x128xf32> to vector<64x128xbf16>
    %c896 = arith.constant 896 : index
    %c0_36 = arith.constant 0 : index
    %46 = vector.load %arg1[%c896, %c0_36] : memref<1152x128xbf16, #tpu.memory_space<vmem>>, vector<128x128xbf16>
    %cst_37 = arith.constant dense<0.000000e+00> : vector<64x128xf32>
    %47 = tpu.matmul %45, %46, %cst_37 {dimension_numbers = #tpu.dot_dimension_numbers<[1], [0], [0], [1], [0, 0, 1, 1], [], []>} : vector<64x128xbf16>, vector<128x128xbf16>, vector<64x128xf32> -> vector<64x128xf32>
    %48 = arith.addf %42, %47 : vector<64x128xf32>
    %c2_38 = arith.constant 2 : index
    %c2_39 = arith.constant 2 : index
    %c0_40 = arith.constant 0 : index
    %49 = vector.load %arg0[%c2_38, %c2_39, %c0_40] : memref<10x10x128xf32, #tpu.memory_space<vmem>>, vector<8x8x128xf32>
    %50 = vector.shape_cast %49 : vector<8x8x128xf32> to vector<64x128xf32>
    %51 = arith.truncf %50 : vector<64x128xf32> to vector<64x128xbf16>
    %c1024 = arith.constant 1024 : index
    %c0_41 = arith.constant 0 : index
    %52 = vector.load %arg1[%c1024, %c0_41] : memref<1152x128xbf16, #tpu.memory_space<vmem>>, vector<128x128xbf16>
    %cst_42 = arith.constant dense<0.000000e+00> : vector<64x128xf32>
    %53 = tpu.matmul %51, %52, %cst_42 {dimension_numbers = #tpu.dot_dimension_numbers<[1], [0], [0], [1], [0, 0, 1, 1], [], []>} : vector<64x128xbf16>, vector<128x128xbf16>, vector<64x128xf32> -> vector<64x128xf32>
    %54 = arith.addf %48, %53 : vector<64x128xf32>
    %cst_43 = arith.constant dense<0.000000e+00> : vector<128xf32>
    %55 = vector.multi_reduction <add>, %54, %cst_43 [0] : vector<64x128xf32> to vector<128xf32>
    %56 = vector.shape_cast %55 : vector<128xf32> to vector<1x128xf32>
    %cst_44 = arith.constant 6.400000e+01 : f32
    %57 = vector.broadcast %cst_44 : f32 to vector<1x128xf32>
    %58 = arith.divf %56, %57 : vector<1x128xf32>
    %59 = vector.broadcast %58 : vector<1x128xf32> to vector<64x128xf32>
    %60 = arith.subf %54, %59 : vector<64x128xf32>
    %61 = arith.mulf %60, %60 : vector<64x128xf32>
    %cst_45 = arith.constant dense<0.000000e+00> : vector<128xf32>
    %62 = vector.multi_reduction <add>, %61, %cst_45 [0] : vector<64x128xf32> to vector<128xf32>
    %63 = vector.shape_cast %62 : vector<128xf32> to vector<1x128xf32>
    %cst_46 = arith.constant 6.300000e+01 : f32
    %64 = vector.broadcast %cst_46 : f32 to vector<1x128xf32>
    %65 = arith.divf %63, %64 : vector<1x128xf32>
    %66 = math.sqrt %65 : vector<1x128xf32>
    %67 = vector.extract_strided_slice %66 {offsets = [0, 0], sizes = [1, 16], strides = [1, 1]} : vector<1x128xf32> to vector<1x16xf32>
    %68 = vector.extract_strided_slice %66 {offsets = [0, 16], sizes = [1, 16], strides = [1, 1]} : vector<1x128xf32> to vector<1x16xf32>
    %69 = vector.extract_strided_slice %66 {offsets = [0, 32], sizes = [1, 16], strides = [1, 1]} : vector<1x128xf32> to vector<1x16xf32>
    %70 = vector.extract_strided_slice %66 {offsets = [0, 48], sizes = [1, 16], strides = [1, 1]} : vector<1x128xf32> to vector<1x16xf32>
    %71 = vector.extract_strided_slice %66 {offsets = [0, 64], sizes = [1, 16], strides = [1, 1]} : vector<1x128xf32> to vector<1x16xf32>
    %72 = vector.extract_strided_slice %66 {offsets = [0, 80], sizes = [1, 16], strides = [1, 1]} : vector<1x128xf32> to vector<1x16xf32>
    %73 = vector.extract_strided_slice %66 {offsets = [0, 96], sizes = [1, 16], strides = [1, 1]} : vector<1x128xf32> to vector<1x16xf32>
    %74 = vector.extract_strided_slice %66 {offsets = [0, 112], sizes = [1, 16], strides = [1, 1]} : vector<1x128xf32> to vector<1x16xf32>
    %75 = tpu.concatenate %67, %68, %69, %70, %71, %72, %73, %74 in 0 : vector<1x16xf32>, vector<1x16xf32>, vector<1x16xf32>, vector<1x16xf32>, vector<1x16xf32>, vector<1x16xf32>, vector<1x16xf32>, vector<1x16xf32> -> vector<8x16xf32>
    %cst_47 = arith.constant dense<0.000000e+00> : vector<8xf32>
    %76 = vector.multi_reduction <add>, %75, %cst_47 [1] : vector<8x16xf32> to vector<8xf32>
    %77 = vector.shape_cast %76 : vector<8xf32> to vector<8x1xf32>
    %cst_48 = arith.constant 1.600000e+01 : f32
    %78 = vector.broadcast %cst_48 : f32 to vector<8x1xf32>
    %79 = arith.divf %77, %78 : vector<8x1xf32>
    %80 = vector.broadcast %79 : vector<8x1xf32> to vector<8x16xf32>
    %81 = arith.subf %75, %80 : vector<8x16xf32>
    %82 = arith.mulf %81, %81 : vector<8x16xf32>
    %cst_49 = arith.constant dense<0.000000e+00> : vector<8xf32>
    %83 = vector.multi_reduction <add>, %82, %cst_49 [1] : vector<8x16xf32> to vector<8xf32>
    %84 = vector.shape_cast %83 : vector<8xf32> to vector<8x1xf32>
    %85 = math.sqrt %84 : vector<8x1xf32>
    %cst_50 = arith.constant 9.99999993E-9 : f32
    %86 = vector.broadcast %cst_50 : f32 to vector<8x1xf32>
    %87 = arith.addf %86, %85 : vector<8x1xf32>
    %88 = vector.broadcast %87 : vector<8x1xf32> to vector<8x16xf32>
    %89 = arith.divf %81, %88 : vector<8x16xf32>
    %90 = tpu.transpose %89, [1, 0] : vector<8x16xf32> -> vector<16x8xf32>
    %cst_51 = arith.constant dense<0.000000e+00> : vector<8x8xf32>
    %91 = tpu.matmul %89, %90, %cst_51 {dimension_numbers = #tpu.dot_dimension_numbers<[1], [0], [0], [1], [0, 0, 1, 1], [], []>} : vector<8x16xf32>, vector<16x8xf32>, vector<8x8xf32> -> vector<8x8xf32>
    %cst_52 = arith.constant -1.000000e+00 : f32
    %cst_53 = arith.constant 1.000000e+00 : f32
    %92 = vector.broadcast %cst_52 : f32 to vector<8x8xf32>
    %93 = arith.maximumf %92, %91 : vector<8x8xf32>
    %94 = vector.broadcast %cst_53 : f32 to vector<8x8xf32>
    %95 = arith.minimumf %94, %93 : vector<8x8xf32>
    %c0_54 = arith.constant 0 : index
    %c0_55 = arith.constant 0 : index
    %96 = vector.load %arg2[%c0_54, %c0_55] : memref<8x1024xf32, #tpu.memory_space<vmem>>, vector<8x1024xf32>
    %97 = arith.truncf %96 : vector<8x1024xf32> to vector<8x1024xbf16>
    %c0_56 = arith.constant 0 : index
    %c0_57 = arith.constant 0 : index
    %98 = vector.load %arg3[%c0_56, %c0_57] : memref<1024x256xbf16, #tpu.memory_space<vmem>>, vector<1024x256xbf16>
    %cst_58 = arith.constant dense<0.000000e+00> : vector<8x256xf32>
    %99 = tpu.matmul %97, %98, %cst_58 {dimension_numbers = #tpu.dot_dimension_numbers<[1], [0], [0], [1], [0, 0, 1, 1], [], []>} : vector<8x1024xbf16>, vector<1024x256xbf16>, vector<8x256xf32> -> vector<8x256xf32>
    %c0_59 = arith.constant 0 : index
    %c0_60 = arith.constant 0 : index
    %100 = vector.load %arg4[%c0_59, %c0_60] : memref<1x256xf32, #tpu.memory_space<vmem>>, vector<1x256xf32>
    %101 = vector.broadcast %100 : vector<1x256xf32> to vector<8x256xf32>
    %102 = arith.addf %99, %101 : vector<8x256xf32>
    %cst_61 = arith.constant dense<0xFF800000> : vector<8xf32>
    %103 = vector.multi_reduction <maximumf>, %102, %cst_61 [1] : vector<8x256xf32> to vector<8xf32>
    %104 = vector.shape_cast %103 : vector<8xf32> to vector<8x1xf32>
    %105 = vector.broadcast %104 : vector<8x1xf32> to vector<8x256xf32>
    %106 = arith.subf %102, %105 : vector<8x256xf32>
    %107 = math.exp %106 : vector<8x256xf32>
    %cst_62 = arith.constant dense<0.000000e+00> : vector<8xf32>
    %108 = vector.multi_reduction <add>, %107, %cst_62 [1] : vector<8x256xf32> to vector<8xf32>
    %109 = vector.shape_cast %108 : vector<8xf32> to vector<8x1xf32>
    %110 = math.log %109 : vector<8x1xf32>
    %111 = arith.addf %104, %110 : vector<8x1xf32>
    %c0_63 = arith.constant 0 : index
    %c0_64 = arith.constant 0 : index
    %112 = vector.load %arg5[%c0_63, %c0_64] : memref<8x256xf32, #tpu.memory_space<vmem>>, vector<8x256xf32>
    %113 = arith.mulf %112, %102 : vector<8x256xf32>
    %cst_65 = arith.constant dense<0.000000e+00> : vector<8xf32>
    %114 = vector.multi_reduction <add>, %113, %cst_65 [1] : vector<8x256xf32> to vector<8xf32>
    %115 = vector.shape_cast %114 : vector<8xf32> to vector<8x1xf32>
    %116 = arith.subf %111, %115 : vector<8x1xf32>
    %cst_66 = arith.constant dense<0.000000e+00> : vector<1xf32>
    %117 = vector.multi_reduction <add>, %116, %cst_66 [0] : vector<8x1xf32> to vector<1xf32>
    %118 = vector.shape_cast %117 : vector<1xf32> to vector<1x1xf32>
    %cst_67 = arith.constant 8.000000e+00 : f32
    %119 = vector.broadcast %cst_67 : f32 to vector<1x1xf32>
    %120 = arith.divf %118, %119 : vector<1x1xf32>
    %c0_68 = arith.constant 0 : index
    %c0_69 = arith.constant 0 : index
    %121 = vector.load %arg6[%c0_68, %c0_69] : memref<8x8xf32, #tpu.memory_space<vmem>>, vector<8x8xf32>
    %122 = arith.subf %95, %121 : vector<8x8xf32>
    %123 = arith.mulf %122, %122 : vector<8x8xf32>
    %cst_70 = arith.constant dense<0.000000e+00> : vector<8xf32>
    %124 = vector.multi_reduction <add>, %123, %cst_70 [1] : vector<8x8xf32> to vector<8xf32>
    %125 = vector.shape_cast %124 : vector<8xf32> to vector<8x1xf32>
    %cst_71 = arith.constant dense<0.000000e+00> : vector<1xf32>
    %126 = vector.multi_reduction <add>, %125, %cst_71 [0] : vector<8x1xf32> to vector<1xf32>
    %127 = vector.shape_cast %126 : vector<1xf32> to vector<1x1xf32>
    %cst_72 = arith.constant 6.400000e+01 : f32
    %128 = vector.broadcast %cst_72 : f32 to vector<1x1xf32>
    %129 = arith.divf %127, %128 : vector<1x1xf32>
    %cst_73 = arith.constant 0.00999999977 : f32
    %130 = vector.broadcast %cst_73 : f32 to vector<1x1xf32>
    %131 = arith.mulf %130, %120 : vector<1x1xf32>
    %cst_74 = arith.constant 9.900000e-01 : f32
    %132 = vector.broadcast %cst_74 : f32 to vector<1x1xf32>
    %133 = arith.mulf %132, %129 : vector<1x1xf32>
    %134 = arith.addf %131, %133 : vector<1x1xf32>
    %c0_75 = arith.constant 0 : index
    %c0_76 = arith.constant 0 : index
    %135 = vector.load %arg7[%c0_75, %c0_76] : memref<1x1xf32, #tpu.memory_space<vmem>>, vector<1x1xf32>
    tpu.vector_store %arg7[%c0_75, %c0_76], %134 {strides = array<i32>} : memref<1x1xf32, #tpu.memory_space<vmem>>, vector<1x1xf32>,
    return
  }
}

</mosaic_0001>

<bundles_post_ra>
// kernel: a_call__.1
= control target key start
LH: loop header
LB: loop body
LE: loop exit
PB: predicated region body
PF: predicated region fallthrough
CT: control target
= control target key end

     0   :  { %s4399_s0 = inlined_call_operand.vmem [shape: f32[10,10,128], index: 0, kind: input, shape index: {}]   ;;  %s4400_s1 = inlined_call_operand.vmem [shape: bf16[1152,128], index: 1, kind: input, shape index: {}]   ;;  %s4401_s2 = inlined_call_operand.vmem [shape: f32[8,1024], index: 2, kind: input, shape index: {}]   ;;  %s4402_s3 = inlined_call_operand.vmem [shape: bf16[1024,256], index: 3, kind: input, shape index: {}]   ;;  %s4403_s4 = inlined_call_operand.vmem [shape: f32[1,256], index: 4, kind: input, shape index: {}]   ;;  %s4404_s5 = inlined_call_operand.vmem [shape: f32[8,256], index: 5, kind: input, shape index: {}]   ;;  %s4405_s6 = inlined_call_operand.vmem [shape: f32[8,8], index: 6, kind: input, shape index: {}]   ;;  %s4406_s7 = inlined_call_operand.hbm [shape: f32[1,1], index: 7, kind: output, shape index: {}]  }
   0x1   :  { %v3156_v0 = vld [vmem:[%s4400_s1 + $0x78] sm:$0xff]   ;;  %v3158_v2 = vld [vmem:[%s4400_s1 + $0x70] sm:$0xff]   ;;  %v3160_v4 = vld [vmem:[%s4400_s1 + $0x68] sm:$0xff]  }
   0x2   :  { %v3157_v1 = vld [vmem:[%s4400_s1 + $0x38] sm:$0xff]   ;;  %2925 = vmatprep.subr.bf16.mxu0 %v3156_v0  ;;  %v3159_v3 = vld [vmem:[%s4400_s1 + $0x30] sm:$0xff]   ;;  %v3161_v5 = vld [vmem:[%s4400_s1 + $0x28] sm:$0xff]  }
   0x3   :  { %2949 = vmatprep.subr.bf16.mxu1 %v3157_v1  ;;  %2926 = vmatpush3.bf16.msra.mxu0 %v3156_v0  ;;  %v3162_v6 = vld [vmem:[%s4400_s1 + $0x60] sm:$0xff]   ;;  %v3164_v8 = vld [vmem:[%s4400_s1 + $0x58] sm:$0xff]   ;;  %v3166_v10 = vld [vmem:[%s4400_s1 + $0x50] sm:$0xff]  }
   0x4   :  { %2950 = vmatpush3.bf16.msra.mxu1 %v3157_v1  ;;  %2927 = vmatprep.subr.bf16.mxu0 %v3158_v2  ;;  %v3163_v7 = vld [vmem:[%s4400_s1 + $0x20] sm:$0xff]   ;;  %v3165_v9 = vld [vmem:[%s4400_s1 + $0x18] sm:$0xff]   ;;  %v3167_v14 = vld [vmem:[%s4400_s1 + $0x10] sm:$0xff]  }
   0x5   :  { %2951 = vmatprep.subr.bf16.mxu1 %v3159_v3  ;;  %v56_v11 = vld [vmem:[%s4399_s0 + $0x1] sm:$0xff]  ;;  %v3543_v12 = vld [vmem:[%s4399_s0 + $0x11] sm:$0xff] }
   0x6   :  { %v28_v13 = vld [vmem:[%s4399_s0] sm:$0xff]  ;;  %v64_v15 = vpack.c.bf16 %v3543_v12, %v56_v11  ;;  %v3555_v16 = vld [vmem:[%s4399_s0 + $0x10] sm:$0xff]  ;;  %v3168_v18 = vld [vmem:[%s4400_s1 + $0x48] sm:$0xff]  }
   0x7   :  { %2928 = vmatpush3.bf16.msra.mxu0 %v3158_v2  ;;  %v36_v17 = vpack.c.bf16 %v3555_v16, %v28_v13  ;;  %v3169_v19 = vld [vmem:[%s4400_s1 + $0x8] sm:$0xff]   ;;  %v3170_v20 = vld [vmem:[%s4400_s1 + $0x40] sm:$0xff]   ;;  %v3578_v23 = vld [vmem:[%s4399_s0 + $0x31] sm:$0xff] }
   0x8   :  { %2952 = vmatpush3.bf16.msra.mxu1 %v3159_v3  ;;  %2929 = vmatprep.subr.bf16.mxu0 %v3160_v4  ;;  %v3171_v21 = vld [vmem:[%s4400_s1] sm:$0xff]   ;;  %v3586_v25 = vld [vmem:[%s4399_s0 + $0x30] sm:$0xff]  ;;  %v3172_v26 = vld [vmem:[%s4400_s1 + $0xb8] sm:$0xff]  }
   0x9   :  { %2953 = vmatprep.subr.bf16.mxu1 %v3161_v5  ;;  %2941 = vmatprep.mubr.bf16.mxu0 %v64_v15  ;;  %v3573_v22 = vld [vmem:[%s4399_s0 + $0x21] sm:$0xff]  ;;  %v3173_v27 = vld [vmem:[%s4400_s1 + $0xf8] sm:$0xff]   ;;  %v3174_v29 = vld [vmem:[%s4400_s1 + $0xb0] sm:$0xff]  }
   0xa   :  { %2965 = vmatprep.mubr.bf16.mxu1 %v36_v17  ;;  %v30_v24 = vld [vmem:[%s4399_s0 + $0x20] sm:$0xff]  ;;  %v3596_v28 = vpack.c.bf16 %v3578_v23, %v3573_v22  ;;  %v3609_v31 = vld [vmem:[%s4399_s0 + $0x51] sm:$0xff]  ;;  %v3176_v38 = vld [vmem:[%s4400_s1 + $0xa8] sm:$0xff]  }
   0xb   :  { %2930 = vmatpush3.bf16.msra.mxu0 %v3160_v4  ;;  %v3604_v30 = vld [vmem:[%s4399_s0 + $0x41] sm:$0xff]  ;;  %v3617_v33 = vpack.c.bf16 %v3586_v25, %v30_v24  ;;  %v3622_v34 = vld [vmem:[%s4399_s0 + $0x50] sm:$0xff]  ;;  %v468_v51 = vpack.c.bf16 %v30_v24, %v3555_v16  ;;  %v3180_v52 = vld [vmem:[%s4400_s1 + $0x98] sm:$0xff]  }
   0xc   :  { %2954 = vmatpush3.bf16.msra.mxu1 %v3161_v5  ;;  %2931 = vmatprep.subr.bf16.mxu0 %v3162_v6  ;;  %v3614_v32 = vld [vmem:[%s4399_s0 + $0x40] sm:$0xff]  ;;  %v3175_v35 = vld [vmem:[%s4400_s1 + $0xf0] sm:$0xff]   ;;  %v3629_v36 = vpack.c.bf16 %v3609_v31, %v3604_v30  ;;  %v3177_v43 = vld [vmem:[%s4400_s1 + $0xe8] sm:$0xff]  }
   0xd   :  { %2955 = vmatprep.subr.bf16.mxu1 %v3163_v7  ;;  %v3634_v37 = vld [vmem:[%s4399_s0 + $0x61] sm:$0xff]  ;;  %v3642_v39 = vpack.c.bf16 %v3622_v34, %v3614_v32  ;;  %v3647_v40 = vld [vmem:[%s4399_s0 + $0x71] sm:$0xff]  ;;  %v469_v3 = vpack.c.bf16 %v3614_v32, %v3586_v25 }
   0xe   :  { %v3653_v41 = vld [vmem:[%s4399_s0 + $0x60] sm:$0xff]  ;;  %v3658_v42 = vld [vmem:[%s4399_s0 + $0x70] sm:$0xff]  ;;  %v3667_v44 = vpack.c.bf16 %v3647_v40, %v3634_v37  ;;  %v3181_v53 = vld [vmem:[%s4400_s1 + $0xd8] sm:$0xff]  }
   0xf   :  { %2932 = vmatpush3.bf16.msra.mxu0 %v3162_v6  ;;  %v310_v45 = vld [vmem:[%s4399_s0 + $0x2] sm:$0xff]  ;;  %v3675_v46 = vld [vmem:[%s4399_s0 + $0x12] sm:$0xff]  ;;  %v3679_v47 = vpack.c.bf16 %v3658_v42, %v3653_v41 }
  0x10   :  { %2956 = vmatpush3.bf16.msra.mxu1 %v3163_v7  ;;  %2933 = vmatprep.subr.bf16.mxu0 %v3164_v8  ;;  %v3178_v48 = vld [vmem:[%s4400_s1 + $0xa0] sm:$0xff]   ;;  %v318_v50 = vpack.c.bf16 %v3675_v46, %v310_v45  ;;  %v3182_v54 = vld [vmem:[%s4400_s1 + $0x90] sm:$0xff]   ;;  %v3184_v56 = vld [vmem:[%s4400_s1 + $0x88] sm:$0xff]  }
  0x11   :  { %2957 = vmatprep.subr.bf16.mxu1 %v3165_v9  ;;  %v3179_v49 = vld [vmem:[%s4400_s1 + $0xe0] sm:$0xff]   ;;  %v3183_v55 = vld [vmem:[%s4400_s1 + $0xd0] sm:$0xff]   ;;  %v3185_v57 = vld [vmem:[%s4400_s1 + $0xc8] sm:$0xff]  }
  0x12   :  { %v3186_v58 = vld [vmem:[%s4400_s1 + $0x80] sm:$0xff]   ;;  %v3721_v61 = vld [vmem:[%s4399_s0 + $0x32] sm:$0xff]  ;;  %v3193_v13 = vld [vmem:[%s4400_s1 + $0x168] sm:$0xff]  }
  0x13   :  { %2934 = vmatpush3.bf16.msra.mxu0 %v3164_v8  ;;  %v3187_v59 = vld [vmem:[%s4400_s1 + $0xc0] sm:$0xff]   ;;  %v3188_v62 = vld [vmem:[%s4400_s1 + $0x138] sm:$0xff]   ;;  %v3190_v4 = vld [vmem:[%s4400_s1 + $0x130] sm:$0xff]  }
  0x14   :  { %2958 = vmatpush3.bf16.msra.mxu1 %v3165_v9  ;;  %2935 = vmatprep.subr.bf16.mxu0 %v3166_v10  ;;  %v312_v60 = vld [vmem:[%s4399_s0 + $0x22] sm:$0xff]  ;;  %v3189_v63 = vld [vmem:[%s4400_s1 + $0x178] sm:$0xff]   ;;  %v3191_v5 = vld [vmem:[%s4400_s1 + $0x170] sm:$0xff]   ;;  %v470_v9 = vpack.c.bf16 %v3653_v41, %v3622_v34  ;;  %v618_v34 = vpack.c.bf16 %v3604_v30, %v3578_v23 }
  0x15   :  { %2959 = vmatprep.subr.bf16.mxu1 %v3167_v14  ;;  %v3732_v0 = vld [vmem:[%s4399_s0 + $0x42] sm:$0xff]  ;;  %v3735_v1 = vpack.c.bf16 %v3721_v61, %v312_v60  ;;  %v3740_v2 = vld [vmem:[%s4399_s0 + $0x52] sm:$0xff] }
  0x16   :  { %v3752_v6 = vpack.c.bf16 %v3740_v2, %v3732_v0  ;;  %v3757_v7 = vld [vmem:[%s4399_s0 + $0x62] sm:$0xff]  ;;  %v3763_v8 = vld [vmem:[%s4399_s0 + $0x72] sm:$0xff] }
  0x17   :  { %2936 = vmatpush3.bf16.msra.mxu0 %v3166_v10  ;;  %v3192_v10 = vld [vmem:[%s4400_s1 + $0x128] sm:$0xff]   ;;  %v3773_v11 = vld [vmem:[%s4399_s0 + $0x80] sm:$0xff]  ;;  %v3205_v32 = vld [vmem:[%s4400_s1 + $0x1f8] sm:$0xff]  }
  0x18   :  { %2960 = vmatpush3.bf16.msra.mxu1 %v3167_v14  ;;  %2937 = vmatprep.subr.bf16.mxu0 %v3168_v18  ;;  %v3781_v14 = vpack.c.bf16 %v3763_v8, %v3757_v7  ;;  %v471_v15 = vpack.c.bf16 %v3773_v11, %v3658_v42  ;;  %v3194_v16 = vld [vmem:[%s4400_s1 + $0x120] sm:$0xff]   ;;  %v3200_v24 = vld [vmem:[%s4400_s1 + $0x108] sm:$0xff]   ;;  %v3207_v41 = vld [vmem:[%s4400_s1 + $0x1f0] sm:$0xff]   ;;  %v619_v42 = vpack.c.bf16 %v3634_v37, %v3609_v31 }
  0x19   :  { %2961 = vmatprep.subr.bf16.mxu1 %v3169_v19  ;;  %v3195_v17 = vld [vmem:[%s4400_s1 + $0x160] sm:$0xff]   ;;  %v3201_v25 = vld [vmem:[%s4400_s1 + $0x148] sm:$0xff]  }
  0x1a   :  { %v3840_v23 = vld [vmem:[%s4399_s0 + $0x81] sm:$0xff] }
  0x1b   :  { %2938 = vmatpush3.bf16.msra.mxu0 %v3168_v18  ;;  %v617_v18 = vpack.c.bf16 %v3573_v22, %v3543_v12  ;;  %v3198_v12 = vld [vmem:[%s4400_s1 + $0x110] sm:$0xff]   ;;  %v3208_v30 = vld [vmem:[%s4400_s1 + $0x1a8] sm:$0xff]   ;;  %v620_v37 = vpack.c.bf16 %v3840_v23, %v3647_v40  ;;  %v3212_v40 = vld [vmem:[%s4400_s1 + $0x198] sm:$0xff]  }
  0x1c   :  { %2962 = vmatpush3.bf16.msra.mxu1 %v3169_v19  ;;  %2939 = vmatprep.subr.bf16.mxu0 %v3170_v20  ;;  %v766_v19 = vpack.c.bf16 %v312_v60, %v3675_v46  ;;  %v3199_v22 = vld [vmem:[%s4400_s1 + $0x150] sm:$0xff]   ;;  %v3850_v45 = vld [vmem:[%s4399_s0 + $0x82] sm:$0xff] }
  0x1d   :  { %2963 = vmatprep.subr.bf16.mxu1 %v3171_v21  ;;  %v3209_v31 = vld [vmem:[%s4400_s1 + $0x1e8] sm:$0xff]   ;;  %v3210_v46 = vld [vmem:[%s4400_s1 + $0x1a0] sm:$0xff]  }
  0x1f   :  { %2940 = vmatpush3.bf16.msra.mxu0 %v3170_v20  ;;  %v3196_v20 = vld [vmem:[%s4400_s1 + $0x118] sm:$0xff]  }
  0x20   :  { %2964 = vmatpush3.bf16.msra.mxu1 %v3171_v21  ;;  %2973 = vmatprep.subr.bf16.mxu0 %v3172_v26  ;;  %v3197_v21 = vld [vmem:[%s4400_s1 + $0x158] sm:$0xff]  }
  0x21   :  { %2997 = vmatprep.subr.bf16.mxu1 %v3173_v27 }
  0x22   :  { %2942 = vmatmul.mubr.bf16.vlgmr.msra.gmra.mxu0 %v3596_v28 }
  0x23   :  { %2966 = vmatmul.mubr.bf16.vlgmr.msra.gmra.mxu1 %v3617_v33  ;;  %2974 = vmatpush3.bf16.msra.mxu0 %v3172_v26  ;;  %v3202_v26 = vld [vmem:[%s4400_s1 + $0x100] sm:$0xff]  }
  0x24   :  { %2998 = vmatpush3.bf16.msra.mxu1 %v3173_v27  ;;  %2975 = vmatprep.subr.bf16.mxu0 %v3174_v29  ;;  %v3203_v27 = vld [vmem:[%s4400_s1 + $0x140] sm:$0xff]  }
  0x25   :  { %2999 = vmatprep.subr.bf16.mxu1 %v3175_v35  ;;  %2945 = vmatprep.mubr.bf16.mxu0 %v3629_v36 }
  0x26   :  { %2969 = vmatprep.mubr.bf16.mxu1 %v3642_v39 }
  0x27   :  { %2976 = vmatpush3.bf16.msra.mxu0 %v3174_v29  ;;  %v3204_v29 = vld [vmem:[%s4400_s1 + $0x1b8] sm:$0xff]  }
  0x28   :  { %3000 = vmatpush3.bf16.msra.mxu1 %v3175_v35  ;;  %2977 = vmatprep.subr.bf16.mxu0 %v3176_v38  ;;  %v3206_v35 = vld [vmem:[%s4400_s1 + $0x1b0] sm:$0xff]  }
  0x29   :  { %3001 = vmatprep.subr.bf16.mxu1 %v3177_v43 }
  0x2a   :  { %2946 = vmatmul.mubr.bf16.gmra.mxu0 %v3667_v44 }
  0x2b   :  { %2978 = vmatpush3.bf16.msra.mxu0 %v3176_v38  ;;  %2970 = vmatmul.mubr.bf16.gmra.mxu1 %v3679_v47  ;;  %v767_v38 = vpack.c.bf16 %v3732_v0, %v3721_v61 }
  0x2c   :  { %3002 = vmatpush3.bf16.msra.mxu1 %v3177_v43  ;;  %2979 = vmatprep.subr.bf16.mxu0 %v3178_v48  ;;  %v768_v43 = vpack.c.bf16 %v3757_v7, %v3740_v2 }
  0x2d   :  { %3003 = vmatprep.subr.bf16.mxu1 %v3179_v49  ;;  %2989 = vmatprep.mubr.bf16.mxu0 %v318_v50  ;;  %v3213_v50 = vld [vmem:[%s4400_s1 + $0x1d8] sm:$0xff]  }
  0x2e   :  { %3013 = vmatprep.mubr.bf16.mxu1 %v468_v51  ;;  %v3214_v51 = vld [vmem:[%s4400_s1 + $0x190] sm:$0xff]  }
  0x2f   :  { %2980 = vmatpush3.bf16.msra.mxu0 %v3178_v48  ;;  %v769_v48 = vpack.c.bf16 %v3850_v45, %v3763_v8 }
  0x30   :  { %3004 = vmatpush3.bf16.msra.mxu1 %v3179_v49  ;;  %2981 = vmatprep.subr.bf16.mxu0 %v3180_v52  ;;  %v3211_v49 = vld [vmem:[%s4400_s1 + $0x1e0] sm:$0xff]  }
  0x31   :  { %3005 = vmatprep.subr.bf16.mxu1 %v3181_v53 }
  0x33   :  { %2982 = vmatpush3.bf16.msra.mxu0 %v3180_v52  ;;  %v3215_v52 = vld [vmem:[%s4400_s1 + $0x1d0] sm:$0xff]  }
  0x34   :  { %3006 = vmatpush3.bf16.msra.mxu1 %v3181_v53  ;;  %2983 = vmatprep.subr.bf16.mxu0 %v3182_v54  ;;  %v3216_v53 = vld [vmem:[%s4400_s1 + $0x188] sm:$0xff]  }
  0x35   :  { %3007 = vmatprep.subr.bf16.mxu1 %v3183_v55 }
  0x37   :  { %2984 = vmatpush3.bf16.msra.mxu0 %v3182_v54  ;;  %v3219_v54 = vld [vmem:[%s4400_s1 + $0x1c0] sm:$0xff]  }
  0x38   :  { %3008 = vmatpush3.bf16.msra.mxu1 %v3183_v55  ;;  %2985 = vmatprep.subr.bf16.mxu0 %v3184_v56  ;;  %v3220_v55 = vld [vmem:[%s4400_s1 + $0x238] sm:$0xff]  }
  0x39   :  { %3009 = vmatprep.subr.bf16.mxu1 %v3185_v57 }
  0x3b   :  { %2986 = vmatpush3.bf16.msra.mxu0 %v3184_v56 }
  0x3c   :  { %3010 = vmatpush3.bf16.msra.mxu1 %v3185_v57  ;;  %2987 = vmatprep.subr.bf16.mxu0 %v3186_v58 }
  0x3d   :  { %3011 = vmatprep.subr.bf16.mxu1 %v3187_v59 }
  0x3f   :  { %2988 = vmatpush3.bf16.msra.mxu0 %v3186_v58 }
  0x40   :  { %3012 = vmatpush3.bf16.msra.mxu1 %v3187_v59  ;;  %3021 = vmatprep.subr.bf16.mxu0 %v3188_v62 }
  0x41   :  { %3045 = vmatprep.subr.bf16.mxu1 %v3189_v63 }
  0x42   :  { %2990 = vmatmul.mubr.bf16.vlgmr.msra.gmra.mxu0 %v3735_v1 }
  0x43   :  { %3022 = vmatpush3.bf16.msra.mxu0 %v3188_v62  ;;  %3014 = vmatmul.mubr.bf16.vlgmr.msra.gmra.mxu1 %v469_v3 }
  0x44   :  { %3046 = vmatpush3.bf16.msra.mxu1 %v3189_v63  ;;  %3023 = vmatprep.subr.bf16.mxu0 %v3190_v4 }
  0x45   :  { %3047 = vmatprep.subr.bf16.mxu1 %v3191_v5  ;;  %2993 = vmatprep.mubr.bf16.mxu0 %v3752_v6 }
  0x46   :  { %3017 = vmatprep.mubr.bf16.mxu1 %v470_v9 }
  0x47   :  { %3024 = vmatpush3.bf16.msra.mxu0 %v3190_v4 }
  0x48   :  { %3048 = vmatpush3.bf16.msra.mxu1 %v3191_v5  ;;  %3025 = vmatprep.subr.bf16.mxu0 %v3192_v10 }
  0x49   :  { %3049 = vmatprep.subr.bf16.mxu1 %v3193_v13 }
  0x4a   :  { %2994 = vmatmul.mubr.bf16.gmra.mxu0 %v3781_v14 }
  0x4b   :  { %3026 = vmatpush3.bf16.msra.mxu0 %v3192_v10  ;;  %3018 = vmatmul.mubr.bf16.gmra.mxu1 %v471_v15 }
  0x4c   :  { %3050 = vmatpush3.bf16.msra.mxu1 %v3193_v13  ;;  %3027 = vmatprep.subr.bf16.mxu0 %v3194_v16 }
  0x4d   :  { %3051 = vmatprep.subr.bf16.mxu1 %v3195_v17  ;;  %3037 = vmatprep.mubr.bf16.mxu0 %v617_v18 }
  0x4e   :  { %3061 = vmatprep.mubr.bf16.mxu1 %v766_v19 }
  0x4f   :  { %3028 = vmatpush3.bf16.msra.mxu0 %v3194_v16 }
  0x50   :  { %3052 = vmatpush3.bf16.msra.mxu1 %v3195_v17  ;;  %3029 = vmatprep.subr.bf16.mxu0 %v3196_v20 }
  0x51   :  { %3053 = vmatprep.subr.bf16.mxu1 %v3197_v21 }
  0x53   :  { %3030 = vmatpush3.bf16.msra.mxu0 %v3196_v20 }
  0x54   :  { %3054 = vmatpush3.bf16.msra.mxu1 %v3197_v21  ;;  %3031 = vmatprep.subr.bf16.mxu0 %v3198_v12 }
  0x55   :  { %3055 = vmatprep.subr.bf16.mxu1 %v3199_v22 }
  0x57   :  { %3032 = vmatpush3.bf16.msra.mxu0 %v3198_v12 }
  0x58   :  { %3056 = vmatpush3.bf16.msra.mxu1 %v3199_v22  ;;  %3033 = vmatprep.subr.bf16.mxu0 %v3200_v24 }
  0x59   :  { %3057 = vmatprep.subr.bf16.mxu1 %v3201_v25 }
  0x5b   :  { %3034 = vmatpush3.bf16.msra.mxu0 %v3200_v24 }
  0x5c   :  { %3058 = vmatpush3.bf16.msra.mxu1 %v3201_v25  ;;  %3035 = vmatprep.subr.bf16.mxu0 %v3202_v26 }
  0x5d   :  { %3059 = vmatprep.subr.bf16.mxu1 %v3203_v27 }
  0x5f   :  { %3036 = vmatpush3.bf16.msra.mxu0 %v3202_v26 }
  0x60   :  { %3060 = vmatpush3.bf16.msra.mxu1 %v3203_v27  ;;  %3069 = vmatprep.subr.bf16.mxu0 %v3204_v29 }
  0x61   :  { %3093 = vmatprep.subr.bf16.mxu1 %v3205_v32 }
  0x62   :  { %3038 = vmatmul.mubr.bf16.vlgmr.msra.gmra.mxu0 %v618_v34 }
  0x63   :  { %3070 = vmatpush3.bf16.msra.mxu0 %v3204_v29  ;;  %3062 = vmatmul.mubr.bf16.vlgmr.msra.gmra.mxu1 %v767_v38 }
  0x64   :  { %3094 = vmatpush3.bf16.msra.mxu1 %v3205_v32  ;;  %3071 = vmatprep.subr.bf16.mxu0 %v3206_v35 }
  0x65   :  { %3095 = vmatprep.subr.bf16.mxu1 %v3207_v41  ;;  %3041 = vmatprep.mubr.bf16.mxu0 %v619_v42 }
  0x66   :  { %3065 = vmatprep.mubr.bf16.mxu1 %v768_v43 }
  0x67   :  { %3072 = vmatpush3.bf16.msra.mxu0 %v3206_v35 }
  0x68   :  { %3096 = vmatpush3.bf16.msra.mxu1 %v3207_v41  ;;  %3073 = vmatprep.subr.bf16.mxu0 %v3208_v30 }
  0x69   :  { %3097 = vmatprep.subr.bf16.mxu1 %v3209_v31 }
  0x6a   :  { %3042 = vmatmul.mubr.bf16.gmra.mxu0 %v620_v37 }
  0x6b   :  { %3074 = vmatpush3.bf16.msra.mxu0 %v3208_v30  ;;  %3066 = vmatmul.mubr.bf16.gmra.mxu1 %v769_v48 }
  0x6c   :  { %3098 = vmatpush3.bf16.msra.mxu1 %v3209_v31  ;;  %3075 = vmatprep.subr.bf16.mxu0 %v3210_v46 }
  0x6d   :  { %3099 = vmatprep.subr.bf16.mxu1 %v3211_v49  ;;  %3085 = vmatprep.mubr.bf16.mxu0 %v3617_v33  ;;  %v3217_v33 = vld [vmem:[%s4400_s1 + $0x1c8] sm:$0xff]  }
  0x6e   :  { %3109 = vmatprep.mubr.bf16.mxu1 %v3596_v28  ;;  %v3218_v28 = vld [vmem:[%s4400_s1 + $0x180] sm:$0xff]  }
  0x6f   :  { %3076 = vmatpush3.bf16.msra.mxu0 %v3210_v46 }
  0x70   :  { %3100 = vmatpush3.bf16.msra.mxu1 %v3211_v49  ;;  %3077 = vmatprep.subr.bf16.mxu0 %v3212_v40 }
  0x71   :  { %3101 = vmatprep.subr.bf16.mxu1 %v3213_v50 }
  0x73   :  { %3078 = vmatpush3.bf16.msra.mxu0 %v3212_v40 }
  0x74   :  { %3102 = vmatpush3.bf16.msra.mxu1 %v3213_v50  ;;  %3079 = vmatprep.subr.bf16.mxu0 %v3214_v51 }
  0x75   :  { %3103 = vmatprep.subr.bf16.mxu1 %v3215_v52 }
  0x77   :  { %3080 = vmatpush3.bf16.msra.mxu0 %v3214_v51 }
  0x78   :  { %3104 = vmatpush3.bf16.msra.mxu1 %v3215_v52  ;;  %3081 = vmatprep.subr.bf16.mxu0 %v3216_v53 }
  0x79   :  { %3105 = vmatprep.subr.bf16.mxu1 %v3217_v33 }
  0x7b   :  { %3082 = vmatpush3.bf16.msra.mxu0 %v3216_v53 }
  0x7c   :  { %3106 = vmatpush3.bf16.msra.mxu1 %v3217_v33  ;;  %3083 = vmatprep.subr.bf16.mxu0 %v3218_v28 }
  0x7d   :  { %12 = vsyncpa [#allocation3], 0  ;;  %3107 = vmatprep.subr.bf16.mxu1 %v3219_v54  ;;  %v3221_v56 = vld [vmem:[%s4400_s1 + $0x230] sm:$0xff]   ;;  %v3222_v58 = vld [vmem:[%s4400_s1 + $0x228] sm:$0xff]   ;;  %s3456_s21 = smov 64   ;;  %s3457_s22 = smov 96  }
  0x7e   :  { %v2643_v57 = vld [vmem:[%s4399_s0 + $0x90] sm:$0xff]  ;;  %v3224_v60 = vld [vmem:[%s4400_s1 + $0x218] sm:$0xff]   ;;  %v3226_v61 = vld [vmem:[%s4400_s1 + $0x208] sm:$0xff]   ;;  %s3458_s23 = smov 32   ;;  %s3459_s24 = smov 48   ;;  %vm1430_vm2 = vcmask 1040384  }
  0x7f   :  { %3084 = vmatpush3.bf16.msra.mxu0 %v3218_v28  ;;  %v2659_v59 = vld [vmem:[%s4399_s0 + $0x91] sm:$0xff]  ;;  %v3227_v62 = vld [vmem:[%s4400_s1 + $0x200] sm:$0xff]   ;;  %s3460_s25 = smov 16   ;;  %vm1432_vm3 = vcmask 1041408   ;;  %vm1434_vm4 = vcmask 1042432   ;;  %vm1436_vm5 = vcmask 1043456  }
  0x80   :  { %3108 = vmatpush3.bf16.msra.mxu1 %v3219_v54  ;;  %3117 = vmatprep.subr.bf16.mxu0 %v3220_v55  ;;  %v2675_v63 = vld [vmem:[%s4399_s0 + $0x92] sm:$0xff]  ;;  %s3454_s0 = smov 80   ;;  %vm1438_vm6 = vcmask 1044480   ;;  %vm1440_vm7 = vcmask 1045504   ;;  %vm1442_vm8 = vcmask 1046528   ;;  %vm1444_vm9 = vcmask 130048  }
  0x81   :  { %v1217_v0 = vpack.c.bf16 %v2675_v63, %v3850_v45  ;;  %vm3462_vm10 = vmmov 0   ;;  %vm2534_vm13 = vcmask 64512   ;;  %vm2548_vm14 = vcmask 0  }
  0x82   :  { %3086 = vmatmul.mubr.bf16.vlgmr.msra.gmra.mxu0 %v3642_v39  ;;  %v919_v39 = vpack.c.bf16 %v2643_v57, %v3773_v11 }
  0x83   :  { %3118 = vmatpush3.bf16.msra.mxu0 %v3220_v55  ;;  %3110 = vmatmul.mubr.bf16.vlgmr.msra.gmra.mxu1 %v3629_v36  ;;  %v1068_v36 = vpack.c.bf16 %v2659_v59, %v3840_v23 }
  0x84   :  { %3119 = vmatprep.subr.bf16.mxu0 %v3221_v56  ;;  %3089 = vmatprep.mubr.bf16.mxu0 %v3679_v47  ;;  %v3223_v47 = vld [vmem:[%s4400_s1 + $0x220] sm:$0xff]  }
  0x85   :  { %3113 = vmatprep.mubr.bf16.mxu1 %v3667_v44  ;;  %v3225_v44 = vld [vmem:[%s4400_s1 + $0x210] sm:$0xff]   ;;  %s3455_s1 = smov 112  }
  0x87   :  { %3120 = vmatpush3.bf16.msra.mxu0 %v3221_v56 }
  0x88   :  { %3121 = vmatprep.subr.bf16.mxu0 %v3222_v58 }
  0x8a   :  { %3090 = vmatmul.mubr.bf16.gmra.mxu0 %v919_v39 }
  0x8b   :  { %3122 = vmatpush3.bf16.msra.mxu0 %v3222_v58  ;;  %3114 = vmatmul.mubr.bf16.gmra.mxu1 %v1068_v36 }
  0x8c   :  { %3123 = vmatprep.subr.bf16.mxu0 %v3223_v47  ;;  %3133 = vmatprep.mubr.bf16.mxu0 %v3735_v1 }
  0x8f   :  { %3124 = vmatpush3.bf16.msra.mxu0 %v3223_v47 }
  0x90   :  { %3125 = vmatprep.subr.bf16.mxu0 %v3224_v60 }
  0x93   :  { %3126 = vmatpush3.bf16.msra.mxu0 %v3224_v60 }
  0x94   :  { %3127 = vmatprep.subr.bf16.mxu0 %v3225_v44 }
  0x97   :  { %3128 = vmatpush3.bf16.msra.mxu0 %v3225_v44 }
  0x98   :  { %3129 = vmatprep.subr.bf16.mxu0 %v3226_v61 }
  0x9b   :  { %3130 = vmatpush3.bf16.msra.mxu0 %v3226_v61 }
  0x9c   :  { %3131 = vmatprep.subr.bf16.mxu0 %v3227_v62 }
  0x9f   :  { %3132 = vmatpush3.bf16.msra.mxu0 %v3227_v62 }
  0xa2   :  { %3134 = vmatmul.mubr.bf16.vlgmr.msra.gmra.mxu0 %v3752_v6 }
  0xa3   :  { %3137 = vmatprep.mubr.bf16.mxu0 %v3781_v14 }
  0xaa   :  { %3138 = vmatmul.mubr.bf16.gmra.mxu0 %v1217_v0 }
  0xe2   :  { %v2943_v1 = vpop.f32.mrf.mxu0 }
  0xe3   :  { %v2967_v4 = vpop.f32.mrf.mxu1 }
  0xe4   :  { %v166_v2 = vpop.f32.mrf.mxu0  ;;  %v288_v47 = vadd.f32 %v2967_v4, %v2943_v1 }
  0xe5   :  { %v279_v8 = vpop.f32.mrf.mxu1 }
  0xe6   :  { %v2944_v3 = vpop.f32.mrf.mxu0  ;;  %v280_v39 = vadd.f32 %v279_v8, %v166_v2 }
  0xe7   :  { %v2968_v10 = vpop.f32.mrf.mxu1 }
  0xe8   :  { %v169_v5 = vpop.f32.mrf.mxu0  ;;  %v291_v63 = vadd.f32 %v2968_v10, %v2944_v3 }
  0xe9   :  { %v282_v11 = vpop.f32.mrf.mxu1 }
  0xea   :  { %v3934_v7 = vpop.f32.mrf.mxu0  ;;  %v283_v36 = vadd.f32 %v282_v11, %v169_v5 }
  0xeb   :  { %4407 = vst [vmem:[#allocation5_spill] sm:$0xff] %v3934_v7  ;;  %v3938_v13 = vpop.f32.mrf.mxu1 }
  0xec   :  { %v182_v9 = vpop.f32.mrf.mxu0  ;;  %4409 = vst [vmem:[#allocation7_spill] sm:$0xff] %v3938_v13 }
  0xed   :  { %v295_v16 = vpop.f32.mrf.mxu1 }
  0xee   :  { %v3936_v6 = vpop.f32.mrf.mxu0 }
  0xef   :  { %4408 = vst [vmem:[#allocation6_spill] sm:$0xff] %v3936_v6  ;;  %v3940_v18 = vpop.f32.mrf.mxu1 }
  0xf0   :  { %v185_v14 = vpop.f32.mrf.mxu0  ;;  %4410 = vst [vmem:[#allocation8_spill] sm:$0xff] %v3940_v18 }
  0xf1   :  { %v298_v20 = vpop.f32.mrf.mxu1 }
  0xf2   :  { %v4418_v2 = vld [vmem:[#allocation5_spill] sm:$0xff] }
  0xf3   :  { %v4419_v5 = vld [vmem:[#allocation7_spill] sm:$0xff] }
  0xf4   :  { %v304_v1 = vadd.f32 %v4419_v5, %v4418_v2 }
  0xf7   :  { %v4421_v3 = vld [vmem:[#allocation8_spill] sm:$0xff] }
 0x102   :  { %v2991_v15 = vpop.f32.mrf.mxu0 }
 0x103   :  { %v3015_v21 = vpop.f32.mrf.mxu1  ;;  %v453_v0 = vadd.f32 %v2991_v15, %v288_v47 }
 0x104   :  { %v420_v17 = vpop.f32.mrf.mxu0 }
 0x105   :  { %v570_v22 = vpop.f32.mrf.mxu1  ;;  %v451_v60 = vadd.f32 %v420_v17, %v280_v39  ;;  %v603_v6 = vadd.f32 %v3015_v21, %v453_v0  ;;  %v4420_v17 = vld [vmem:[#allocation6_spill] sm:$0xff] }
 0x106   :  { %v2992_v19 = vpop.f32.mrf.mxu0  ;;  %v307_v10 = vadd.f32 %v4421_v3, %v4420_v17 }
 0x107   :  { %v3016_v25 = vpop.f32.mrf.mxu1 }
 0x108   :  { %v423_v12 = vpop.f32.mrf.mxu0 }
 0x109   :  { %v573_v27 = vpop.f32.mrf.mxu1  ;;  %v452_v44 = vadd.f32 %v423_v12, %v283_v36 }
 0x10a   :  { %v2995_v24 = vpop.f32.mrf.mxu0 }
 0x10b   :  { %v3942_v32 = vpop.f32.mrf.mxu1 }
 0x10c   :  { %v436_v26 = vpop.f32.mrf.mxu0  ;;  %4411 = vst [vmem:[#allocation9_spill] sm:$0xff] %v3942_v32 }
 0x10d   :  { %v586_v38 = vpop.f32.mrf.mxu1 }
 0x10e   :  { %v2996_v29 = vpop.f32.mrf.mxu0 }
 0x10f   :  { %v3944_v42 = vpop.f32.mrf.mxu1  ;;  %v458_v21 = vadd.f32 %v2996_v29, %v307_v10 }
 0x110   :  { %v439_v34 = vpop.f32.mrf.mxu0  ;;  %4412 = vst [vmem:[#allocation10_spill] sm:$0xff] %v3944_v42  ;;  %v299_v42 = vadd.f32 %v298_v20, %v185_v14 }
 0x111   :  { %v589_v30 = vpop.f32.mrf.mxu1 }
 0x112   :  { %v456_v4 = vadd.f32 %v439_v34, %v299_v42 }
 0x113   :  { %v4422_v34 = vld [vmem:[#allocation9_spill] sm:$0xff] }
 0x122   :  { %v3039_v35 = vpop.f32.mrf.mxu0 }
 0x123   :  { %v3063_v43 = vpop.f32.mrf.mxu1  ;;  %v752_v11 = vadd.f32 %v3039_v35, %v603_v6 }
 0x124   :  { %v719_v41 = vpop.f32.mrf.mxu0 }
 0x125   :  { %v868_v31 = vpop.f32.mrf.mxu1 }
 0x126   :  { %v3040_v23 = vpop.f32.mrf.mxu0 }
 0x127   :  { %v3064_v46 = vpop.f32.mrf.mxu1 }
 0x128   :  { %v722_v45 = vpop.f32.mrf.mxu0 }
 0x129   :  { %v871_v49 = vpop.f32.mrf.mxu1 }
 0x12a   :  { %v3946_v37 = vpop.f32.mrf.mxu0 }
 0x12b   :  { %4413 = vst [vmem:[#allocation11_spill] sm:$0xff] %v3946_v37  ;;  %v3950_v50 = vpop.f32.mrf.mxu1  ;;  %v601_v37 = vadd.f32 %v570_v22, %v451_v60  ;;  %v606_v22 = vadd.f32 %v589_v30, %v456_v4 }
 0x12c   :  { %v735_v48 = vpop.f32.mrf.mxu0  ;;  %4415 = vst [vmem:[#allocation13_spill] sm:$0xff] %v3950_v50  ;;  %v296_v50 = vadd.f32 %v295_v16, %v182_v9  ;;  %v457_v9 = vadd.f32 %v2995_v24, %v304_v1 }
 0x12d   :  { %v884_v53 = vpop.f32.mrf.mxu1  ;;  %v750_v7 = vadd.f32 %v719_v41, %v601_v37 }
 0x12e   :  { %v3948_v40 = vpop.f32.mrf.mxu0  ;;  %v455_v13 = vadd.f32 %v436_v26, %v296_v50  ;;  %v4423_v50 = vld [vmem:[#allocation10_spill] sm:$0xff] }
 0x12f   :  { %4414 = vst [vmem:[#allocation12_spill] sm:$0xff] %v3948_v40  ;;  %v3952_v28 = vpop.f32.mrf.mxu1  ;;  %v454_v40 = vadd.f32 %v2992_v19, %v291_v63  ;;  %v899_v20 = vadd.f32 %v868_v31, %v750_v7 }
 0x130   :  { %v738_v51 = vpop.f32.mrf.mxu0  ;;  %4416 = vst [vmem:[#allocation14_spill] sm:$0xff] %v3952_v28  ;;  %v602_v28 = vadd.f32 %v573_v27, %v452_v44  ;;  %v605_v19 = vadd.f32 %v586_v38, %v455_v13  ;;  %v901_v27 = vadd.f32 %v3063_v43, %v752_v11 }
 0x131   :  { %v887_v55 = vpop.f32.mrf.mxu1  ;;  %v604_v8 = vadd.f32 %v3016_v25, %v454_v40  ;;  %v607_v25 = vadd.f32 %v4422_v34, %v457_v9  ;;  %v755_v6 = vadd.f32 %v738_v51, %v606_v22 }
 0x132   :  { %v754_v41 = vadd.f32 %v735_v48, %v605_v19  ;;  %v4424_v13 = vld [vmem:[#allocation11_spill] sm:$0xff] }
 0x133   :  { %v753_v14 = vadd.f32 %v3040_v23, %v604_v8  ;;  %v756_v38 = vadd.f32 %v4424_v13, %v607_v25 }
 0x134   :  { %v903_v23 = vadd.f32 %v884_v53, %v754_v41 }
 0x135   :  { %v902_v40 = vadd.f32 %v3064_v46, %v753_v14  ;;  %v4426_v46 = vld [vmem:[#allocation13_spill] sm:$0xff] }
 0x136   :  { %v4425_v43 = vld [vmem:[#allocation12_spill] sm:$0xff] }
 0x137   :  { %v4427_v53 = vld [vmem:[#allocation14_spill] sm:$0xff] }
 0x142   :  { %v3087_v52 = vpop.f32.mrf.mxu0 }
 0x143   :  { %v3111_v56 = vpop.f32.mrf.mxu1  ;;  %v1051_v24 = vadd.f32 %v3087_v52, %v901_v27  ;;  %v905_v52 = vadd.f32 %v4426_v46, %v756_v38 }
 0x144   :  { %v1018_v33 = vpop.f32.mrf.mxu0 }
 0x145   :  { %v1167_v58 = vpop.f32.mrf.mxu1 }
 0x146   :  { %v3088_v54 = vpop.f32.mrf.mxu0 }
 0x147   :  { %v3112_v61 = vpop.f32.mrf.mxu1  ;;  %v1052_v29 = vadd.f32 %v3088_v54, %v902_v40 }
 0x148   :  { %v1021_v57 = vpop.f32.mrf.mxu0 }
 0x149   :  { %v1170_v32 = vpop.f32.mrf.mxu1  ;;  %v1201_v60 = vadd.f32 %v3112_v61, %v1052_v29 }
 0x14a   :  { %v3954_v59 = vpop.f32.mrf.mxu0 }
 0x14b   :  { %4417 = vst [vmem:[#allocation15_spill] sm:$0xff] %v3954_v59  ;;  %v751_v59 = vadd.f32 %v722_v45, %v602_v28  ;;  %v3115_v15 = vpop.f32.mrf.mxu1  ;;  %v1049_v45 = vadd.f32 %v1018_v33, %v899_v20  ;;  %v608_v28 = vadd.f32 %v4423_v50, %v458_v21 }
 0x14c   :  { %v1034_v62 = vpop.f32.mrf.mxu0 }
 0x14d   :  { %v900_v12 = vadd.f32 %v871_v49, %v751_v59  ;;  %v1183_v35 = vpop.f32.mrf.mxu1  ;;  %v1198_v30 = vadd.f32 %v1167_v58, %v1049_v45  ;;  %v757_v48 = vadd.f32 %v4425_v43, %v608_v28  ;;  %v904_v49 = vadd.f32 %v887_v55, %v755_v6 }
 0x14e   :  { %v3092_v18 = vpop.f32.mrf.mxu0  ;;  %v1200_v59 = vadd.f32 %v3111_v56, %v1051_v24  ;;  %v1053_v51 = vadd.f32 %v1034_v62, %v903_v23 }
 0x14f   :  { %v1050_v37 = vadd.f32 %v1021_v57, %v900_v12  ;;  %v3116_v33 = vpop.f32.mrf.mxu1  ;;  %v906_v54 = vadd.f32 %v4427_v53, %v757_v48 }
 0x150   :  { %v1037_v16 = vpop.f32.mrf.mxu0  ;;  %v1202_v55 = vadd.f32 %v1183_v35, %v1053_v51 }
 0x151   :  { %v1199_v31 = vadd.f32 %v1170_v32, %v1050_v37  ;;  %v1054_v44 = vadd.f32 %v1037_v16, %v904_v49  ;;  %v1186_v58 = vpop.f32.mrf.mxu1  ;;  %v1056_v62 = vadd.f32 %v3092_v18, %v906_v54 }
 0x152   :  { %v4428_v2 = vld [vmem:[#allocation15_spill] sm:$0xff] }
 0x153   :  { %v1055_v5 = vadd.f32 %v4428_v2, %v905_v52  ;;  %v1203_v8 = vadd.f32 %v1186_v58, %v1054_v44  ;;  %v1205_v16 = vadd.f32 %v3116_v33, %v1056_v62 }
 0x155   :  { %v1204_v10 = vadd.f32 %v3115_v15, %v1055_v5 }
 0x162   :  { %v3135_v26 = vpop.f32.mrf.mxu0 }
 0x163   :  { %v1349_v63 = vadd.f32 %v3135_v26, %v1200_v59 }
 0x164   :  { %v1316_v42 = vpop.f32.mrf.mxu0 }
 0x165   :  { %v1347_v39 = vadd.f32 %v1316_v42, %v1198_v30 }
 0x166   :  { %v3136_v7 = vpop.f32.mrf.mxu0 }
 0x167   :  { %v1350_v1 = vadd.f32 %v3136_v7, %v1201_v60 }
 0x168   :  { %v1319_v57 = vpop.f32.mrf.mxu0 }
 0x169   :  { %v1348_v36 = vadd.f32 %v1319_v57, %v1199_v31 }
 0x16a   :  { %v3139_v47 = vpop.f32.mrf.mxu0 }
 0x16b   :  { %v1355_v0 = vadd.f32 %v1348_v36, %v1347_v39  ;;  %v1353_v19 = vadd.f32 %v3139_v47, %v1204_v10 }
 0x16c   :  { %v1332_v32 = vpop.f32.mrf.mxu0 }
 0x16d   :  { %v1356_v4 = vadd.f32 %v1355_v0, %v1349_v63  ;;  %v1351_v11 = vadd.f32 %v1332_v32, %v1202_v55 }
 0x16e   :  { %v3140_v56 = vpop.f32.mrf.mxu0 }
 0x16f   :  { %v1357_v17 = vadd.f32 %v1356_v4, %v1350_v1  ;;  %v1354_v20 = vadd.f32 %v3140_v56, %v1205_v16 }
 0x170   :  { %v1335_v3 = vpop.f32.mrf.mxu0 }
 0x171   :  { %v1358_v61 = vadd.f32 %v1357_v17, %v1351_v11  ;;  %v1352_v9 = vadd.f32 %v1335_v3, %v1203_v8 }
 0x173   :  { %v1359_v14 = vadd.f32 %v1358_v61, %v1352_v9 }
 0x175   :  { %v1360_v12 = vadd.f32 %v1359_v14, %v1353_v19 }
 0x177   :  { %v1361_v21 = vadd.f32 %v1360_v12, %v1354_v20  ;;  %v3461_v12 = vmov 0.0  }
 0x178   :  { %3141 = vmatprep.subr.mxu1 %v3461_v12  ;;  %3143 = vmatprep.mubr.msk.f32.mxu1 %vm3462_vm10, %v3461_v12 }
 0x179   :  { %v1362_v22 = vrot.slane %v1361_v21, 4 }
 0x17b   :  { %v1363_v26 = vadd.f32 %v1362_v22, %v1361_v21  ;;  %v3233_v21 = vld [vmem:[%s4402_s3 + $0x174] ss:$8 sps:$4 sm:$0xff]   ;;  %v3231_v22 = vld [vmem:[%s4402_s3 + $0x170] ss:$8 sps:$4 sm:$0xff]  }
 0x17c   :  { %2377 = vmatprep.subr.bf16.mxu0 %v3233_v21  ;;  %v3393_v21 = vld [vmem:[%s4402_s3 + $0x3c0] ss:$8 sps:$4 sm:$0xff]  }
 0x17d   :  { %v1364_v27 = vrot.slane %v1363_v26, 2  ;;  %2378 = vmatpush1.bf16.msra.mxu0 %v3231_v22 }
 0x17f   :  { %v1365_v41 = vadd.f32 %v1364_v27, %v1363_v26  ;;  %v3239_v26 = vld [vmem:[%s4402_s3 + $0x164] ss:$8 sps:$4 sm:$0xff]   ;;  %v3237_v27 = vld [vmem:[%s4402_s3 + $0x160] ss:$8 sps:$4 sm:$0xff]  }
 0x180   :  { %2379 = vmatprep.subr.bf16.mxu0 %v3239_v26 }
 0x181   :  { %v1366_v45 = vrot.slane %v1365_v41, 1  ;;  %2380 = vmatpush1.bf16.msra.mxu0 %v3237_v27 }
 0x183   :  { %v1367_v37 = vadd.f32 %v1366_v45, %v1365_v41  ;;  %v3245_v41 = vld [vmem:[%s4402_s3 + $0x154] ss:$8 sps:$4 sm:$0xff]   ;;  %v3243_v45 = vld [vmem:[%s4402_s3 + $0x150] ss:$8 sps:$4 sm:$0xff]  }
 0x184   :  { %2381 = vmatprep.subr.bf16.mxu0 %v3245_v41  ;;  %v3401_v41 = vld [vmem:[%s4402_s3 + $0x3b4] ss:$8 sps:$4 sm:$0xff]  }
 0x185   :  { %v1369_v18 = vmul.f32 0.015625, %v1367_v37  ;;  %2382 = vmatpush1.bf16.msra.mxu0 %v3243_v45  ;;  %v3251_v37 = vld [vmem:[%s4402_s3 + $0x144] ss:$8 sps:$4 sm:$0xff]   ;;  %v3399_v45 = vld [vmem:[%s4402_s3 + $0x3b0] ss:$8 sps:$4 sm:$0xff]  }
 0x186   :  { %2383 = vmatprep.subr.bf16.mxu0 %v3251_v37  ;;  %v3407_v37 = vld [vmem:[%s4402_s3 + $0x3a4] ss:$8 sps:$4 sm:$0xff]  }
 0x187   :  { %v1370_v34 = vsub.f32 %v1347_v39, %v1369_v18  ;;  %v1371_v25 = vsub.f32 %v1348_v36, %v1369_v18  ;;  %v1372_v6 = vsub.f32 %v1349_v63, %v1369_v18  ;;  %v1373_v35 = vsub.f32 %v1350_v1, %v1369_v18 }
 0x188   :  { %v1374_v40 = vsub.f32 %v1351_v11, %v1369_v18  ;;  %v1375_v28 = vsub.f32 %v1352_v9, %v1369_v18  ;;  %v1376_v7 = vsub.f32 %v1353_v19, %v1369_v18  ;;  %v1377_v30 = vsub.f32 %v1354_v20, %v1369_v18  ;;  %v3249_v18 = vld [vmem:[%s4402_s3 + $0x140] ss:$8 sps:$4 sm:$0xff]  }
 0x189   :  { %v1378_v15 = vmul.f32 %v1370_v34, %v1370_v34  ;;  %v1379_v42 = vmul.f32 %v1371_v25, %v1371_v25  ;;  %v1380_v24 = vmul.f32 %v1372_v6, %v1372_v6  ;;  %v1381_v13 = vmul.f32 %v1373_v35, %v1373_v35  ;;  %2384 = vmatpush1.bf16.msra.mxu0 %v3249_v18  ;;  %v3257_v34 = vld [vmem:[%s4402_s3 + $0x134] ss:$8 sps:$4 sm:$0xff]   ;;  %v3255_v25 = vld [vmem:[%s4402_s3 + $0x130] ss:$8 sps:$4 sm:$0xff]   ;;  %v3263_v6 = vld [vmem:[%s4402_s3 + $0x124] ss:$8 sps:$4 sm:$0xff]  }
 0x18a   :  { %v1382_v23 = vmul.f32 %v1374_v40, %v1374_v40  ;;  %v1383_v31 = vmul.f32 %v1375_v28, %v1375_v28  ;;  %v1384_v48 = vmul.f32 %v1376_v7, %v1376_v7  ;;  %v1385_v33 = vmul.f32 %v1377_v30, %v1377_v30  ;;  %2385 = vmatprep.subr.bf16.mxu0 %v3257_v34  ;;  %v3261_v35 = vld [vmem:[%s4402_s3 + $0x120] ss:$8 sps:$4 sm:$0xff]   ;;  %v3275_v40 = vld [vmem:[%s4402_s3 + $0x104] ss:$8 sps:$4 sm:$0xff]   ;;  %v3279_v28 = vld [vmem:[%s4402_s3 + $0x1f0] ss:$8 sps:$4 sm:$0xff]  }
 0x18b   :  { %v1386_v50 = vadd.f32 %v1379_v42, %v1378_v15  ;;  %v3269_v15 = vld [vmem:[%s4402_s3 + $0x114] ss:$8 sps:$4 sm:$0xff]   ;;  %v3267_v42 = vld [vmem:[%s4402_s3 + $0x110] ss:$8 sps:$4 sm:$0xff]   ;;  %v3297_v30 = vld [vmem:[%s4402_s3 + $0x1c0] ss:$8 sps:$4 sm:$0xff]  }
 0x18c   :  { %v3293_v7 = vld [vmem:[%s4402_s3 + $0x1d4] ss:$8 sps:$4 sm:$0xff]   ;;  %v3405_v18 = vld [vmem:[%s4402_s3 + $0x3a0] ss:$8 sps:$4 sm:$0xff]  }
 0x18d   :  { %v1387_v38 = vadd.f32 %v1386_v50, %v1380_v24  ;;  %2386 = vmatpush1.bf16.msra.mxu0 %v3255_v25  ;;  %v3273_v24 = vld [vmem:[%s4402_s3 + $0x100] ss:$8 sps:$4 sm:$0xff]   ;;  %v3281_v50 = vld [vmem:[%s4402_s3 + $0x1f4] ss:$8 sps:$4 sm:$0xff]   ;;  %v3411_v25 = vld [vmem:[%s4402_s3 + $0x390] ss:$8 sps:$4 sm:$0xff]  }
 0x18e   :  { %2387 = vmatprep.subr.bf16.mxu0 %v3263_v6  ;;  %v3413_v34 = vld [vmem:[%s4402_s3 + $0x394] ss:$8 sps:$4 sm:$0xff]   ;;  %v3419_v6 = vld [vmem:[%s4402_s3 + $0x384] ss:$8 sps:$4 sm:$0xff]  }
 0x18f   :  { %v1388_v29 = vadd.f32 %v1387_v38, %v1381_v13  ;;  %v3287_v13 = vld [vmem:[%s4402_s3 + $0x1e4] ss:$8 sps:$4 sm:$0xff]   ;;  %v3285_v38 = vld [vmem:[%s4402_s3 + $0x1e0] ss:$8 sps:$4 sm:$0xff]  }
 0x191   :  { %v1389_v43 = vadd.f32 %v1388_v29, %v1382_v23  ;;  %2388 = vmatpush1.bf16.msra.mxu0 %v3261_v35  ;;  %v3291_v23 = vld [vmem:[%s4402_s3 + $0x1d0] ss:$8 sps:$4 sm:$0xff]   ;;  %v3299_v29 = vld [vmem:[%s4402_s3 + $0x1c4] ss:$8 sps:$4 sm:$0xff]   ;;  %v3417_v35 = vld [vmem:[%s4402_s3 + $0x380] ss:$8 sps:$4 sm:$0xff]  }
 0x192   :  { %2389 = vmatprep.subr.bf16.mxu0 %v3269_v15  ;;  %v1547_v15 = vld [vmem:[%s4401_s2 + $0x38] sm:$0xff] }
 0x193   :  { %v1390_v49 = vadd.f32 %v1389_v43, %v1383_v31  ;;  %v3305_v31 = vld [vmem:[%s4402_s3 + $0x1b4] ss:$8 sps:$4 sm:$0xff]   ;;  %v3303_v43 = vld [vmem:[%s4402_s3 + $0x1b0] ss:$8 sps:$4 sm:$0xff]  }
 0x195   :  { %v1391_v57 = vadd.f32 %v1390_v49, %v1384_v48  ;;  %2390 = vmatpush1.bf16.msra.mxu0 %v3267_v42  ;;  %v3311_v48 = vld [vmem:[%s4402_s3 + $0x1a4] ss:$8 sps:$4 sm:$0xff]   ;;  %v3309_v49 = vld [vmem:[%s4402_s3 + $0x1a0] ss:$8 sps:$4 sm:$0xff]  }
 0x196   :  { %2391 = vmatprep.subr.bf16.mxu0 %v3275_v40  ;;  %v3230_v40 = vld [vmem:[%s4402_s3 + $0x74] ss:$8 sps:$4 sm:$0xff]  }
 0x197   :  { %v1392_v59 = vadd.f32 %v1391_v57, %v1385_v33  ;;  %v3317_v33 = vld [vmem:[%s4402_s3 + $0x194] ss:$8 sps:$4 sm:$0xff]   ;;  %v3315_v57 = vld [vmem:[%s4402_s3 + $0x190] ss:$8 sps:$4 sm:$0xff]  }
 0x199   :  { %v1393_v51 = vrot.slane %v1392_v59, 4  ;;  %2392 = vmatpush1.bf16.msra.mxu0 %v3273_v24  ;;  %v1541_v24 = vld [vmem:[%s4401_s2 + $0x8] sm:$0xff] }
 0x19a   :  { %2393 = vmatprep.subr.bf16.mxu0 %v3281_v50  ;;  %v1555_v50 = vpack.c.bf16 %v1547_v15, %v1547_v15  ;;  %v3386_v15 = vld [vmem:[%s4402_s3 + $0x2d4] ss:$8 sps:$4 sm:$0xff]  }
 0x19b   :  { %v1394_v39 = vadd.f32 %v1393_v51, %v1392_v59  ;;  %v3323_v59 = vld [vmem:[%s4402_s3 + $0x184] ss:$8 sps:$4 sm:$0xff]   ;;  %v3321_v51 = vld [vmem:[%s4402_s3 + $0x180] ss:$8 sps:$4 sm:$0xff]  }
 0x19d   :  { %v1395_v36 = vrot.slane %v1394_v39, 2  ;;  %2394 = vmatpush2.bf16.msra.mxu0 %v3279_v28  ;;  %v1546_v28 = vld [vmem:[%s4401_s2 + $0x30] sm:$0xff] }
 0x19e   :  { %2395 = vmatprep.subr.bf16.mxu0 %v3287_v13 }
 0x19f   :  { %v1396_v46 = vadd.f32 %v1395_v36, %v1394_v39  ;;  %v1543_v39 = vld [vmem:[%s4401_s2 + $0x18] sm:$0xff] }
 0x1a0   :  { %v1551_v36 = vpack.c.bf16 %v1543_v39, %v1543_v39  ;;  %v3264_v39 = vld [vmem:[%s4402_s3 + $0x10] ss:$8 sps:$4 sm:$0xff]  }
 0x1a1   :  { %v1397_v52 = vrot.slane %v1396_v46, 1  ;;  %2396 = vmatpush2.bf16.msra.mxu0 %v3285_v38  ;;  %v1554_v38 = vpack.c.bf16 %v1546_v28, %v1546_v28  ;;  %v3396_v28 = vld [vmem:[%s4402_s3 + $0x2b0] ss:$8 sps:$4 sm:$0xff]  }
 0x1a2   :  { %2397 = vmatprep.subr.bf16.mxu0 %v3293_v7  ;;  %2409 = vmatprep.mubr.bf16.mxu0 %v1551_v36  ;;  %v3228_v7 = vld [vmem:[%s4402_s3 + $0x70] ss:$8 sps:$4 sm:$0xff]   ;;  %v3272_v36 = vld [vmem:[%s4402_s3 + $0x4] ss:$8 sps:$4 sm:$0xff]  }
 0x1a3   :  { %v1398_v47 = vadd.f32 %v1397_v52, %v1396_v46  ;;  %v3329_v46 = vld [vmem:[%s4402_s3 + $0x374] ss:$8 sps:$4 sm:$0xff]  }
 0x1a4   :  { %v1542_v52 = vld [vmem:[%s4401_s2 + $0x10] sm:$0xff] }
 0x1a5   :  { %v1400_v60 = vmul.f32 0.015873017, %v1398_v47  ;;  %2398 = vmatpush2.bf16.msra.mxu0 %v3291_v23  ;;  %v3327_v47 = vld [vmem:[%s4402_s3 + $0x370] ss:$8 sps:$4 sm:$0xff]   ;;  %v1549_v23 = vpack.c.bf16 %v1541_v24, %v1541_v24  ;;  %v3390_v24 = vld [vmem:[%s4402_s3 + $0x2c0] ss:$8 sps:$4 sm:$0xff]  }
 0x1a6   :  { %2399 = vmatprep.subr.bf16.mxu0 %v3299_v29  ;;  %v3236_v29 = vld [vmem:[%s4402_s3 + $0x64] ss:$8 sps:$4 sm:$0xff]  }
 0x1a7   :  { %3420 = vrsqrt.f32 %v1400_v60  ;;  %vm1403_vm0 = vcmp.eq.f32.partialorder %v1400_v60, inf  ;;  %v1406_v0 = vand.u32 2147483648, %v1400_v60  ;;  %vm1405_vm1 = vcmp.eq.f32.partialorder %v1400_v60, 0.0 }
 0x1a9   :  { %2400 = vmatpush2.bf16.msra.mxu0 %v3297_v30  ;;  %v3242_v30 = vld [vmem:[%s4402_s3 + $0x54] ss:$8 sps:$4 sm:$0xff]  }
 0x1aa   :  { %2401 = vmatprep.subr.bf16.mxu0 %v3305_v31  ;;  %v3240_v31 = vld [vmem:[%s4402_s3 + $0x50] ss:$8 sps:$4 sm:$0xff]  }
 0x1ad   :  { %2402 = vmatpush2.bf16.msra.mxu0 %v3303_v43  ;;  %v3248_v43 = vld [vmem:[%s4402_s3 + $0x44] ss:$8 sps:$4 sm:$0xff]  }
 0x1ae   :  { %2403 = vmatprep.subr.bf16.mxu0 %v3311_v48  ;;  %v3246_v48 = vld [vmem:[%s4402_s3 + $0x40] ss:$8 sps:$4 sm:$0xff]  }
 0x1b1   :  { %2404 = vmatpush2.bf16.msra.mxu0 %v3309_v49  ;;  %v3254_v49 = vld [vmem:[%s4402_s3 + $0x34] ss:$8 sps:$4 sm:$0xff]  }
 0x1b2   :  { %2405 = vmatprep.subr.bf16.mxu0 %v3317_v33  ;;  %v3252_v33 = vld [vmem:[%s4402_s3 + $0x30] ss:$8 sps:$4 sm:$0xff]  }
 0x1b4   :  { %v3421_v44 = vpop.eup %3420 }
 0x1b5   :  { %v1402_v63 = vmul.f32 %v3421_v44, %v1400_v60  ;;  %2406 = vmatpush2.bf16.msra.mxu0 %v3315_v57  ;;  %v3335_v44 = vld [vmem:[%s4402_s3 + $0x364] ss:$8 sps:$4 sm:$0xff]  }
 0x1b6   :  { %2407 = vmatprep.subr.bf16.mxu0 %v3323_v59  ;;  %v3260_v57 = vld [vmem:[%s4402_s3 + $0x24] ss:$8 sps:$4 sm:$0xff]   ;;  %v3258_v59 = vld [vmem:[%s4402_s3 + $0x20] ss:$8 sps:$4 sm:$0xff]  }
 0x1b7   :  { %v1404_v53 = vsel %vm1403_vm0, %v1400_v60, %v1402_v63  ;;  %v1550_v60 = vpack.c.bf16 %v1542_v52, %v1542_v52  ;;  %v3333_v63 = vld [vmem:[%s4402_s3 + $0x360] ss:$8 sps:$4 sm:$0xff]   ;;  %v3278_v52 = vld [vmem:[%s4402_s3 + $0xf4] ss:$8 sps:$4 sm:$0xff]  }
 0x1b8   :  { %v1407_v54 = vsel %vm1405_vm1, %v1406_v0, %v1404_v53  ;;  %v3341_v0 = vld [vmem:[%s4402_s3 + $0x354] ss:$8 sps:$4 sm:$0xff]   ;;  %v3339_v53 = vld [vmem:[%s4402_s3 + $0x350] ss:$8 sps:$4 sm:$0xff]  }
 0x1b9   :  { %1415 = vrot.lane.b32.xlu1 %v1407_v54, %s3454_s0  ;;  %1409 = vrot.lane.b32.xlu0 %v1407_v54, %s3455_s1 }
 0x1ba   :  { %2408 = vmatpush2.bf16.msra.mxu0 %v3321_v51  ;;  %v3266_v51 = vld [vmem:[%s4402_s3 + $0x14] ss:$8 sps:$4 sm:$0xff]  }
 0x1bb   :  { %2459 = vmatprep.subr.bf16.mxu0 %v3329_v46  ;;  %v3270_v46 = vld [vmem:[%s4402_s3] ss:$8 sps:$4 sm:$0xff]  }
 0x1bd   :  { %1418 = vrot.lane.b32.xlu1 %v1407_v54, %s3456_s21  ;;  %1412 = vrot.lane.b32.xlu0 %v1407_v54, %s3457_s22 }
 0x1be   :  { %2410 = vmatmul.mubr.bf16.vlgmr.msra.gmra.mxu0 %v1550_v60  ;;  %v3284_v60 = vld [vmem:[%s4402_s3 + $0xe4] ss:$8 sps:$4 sm:$0xff]  }
 0x1bf   :  { %2460 = vmatpush1.bf16.msra.mxu0 %v3327_v47  ;;  %2491 = vmatprep.mubr.bf16.mxu0 %v1555_v50  ;;  %v3276_v47 = vld [vmem:[%s4402_s3 + $0xf0] ss:$8 sps:$4 sm:$0xff]   ;;  %v3398_v50 = vld [vmem:[%s4402_s3 + $0x2b4] ss:$8 sps:$4 sm:$0xff]  }
 0x1c0   :  { %2461 = vmatprep.subr.bf16.mxu0 %v3335_v44  ;;  %v3282_v44 = vld [vmem:[%s4402_s3 + $0xe0] ss:$8 sps:$4 sm:$0xff]  }
 0x1c1   :  { %1424 = vrot.lane.b32.xlu1 %v1407_v54, %s3458_s23  ;;  %1421 = vrot.lane.b32.xlu0 %v1407_v54, %s3459_s24 }
 0x1c3   :  { %2462 = vmatpush1.bf16.msra.mxu0 %v3333_v63  ;;  %v3290_v63 = vld [vmem:[%s4402_s3 + $0xd4] ss:$8 sps:$4 sm:$0xff]  }
 0x1c4   :  { %2463 = vmatprep.subr.bf16.mxu0 %v3341_v0  ;;  %v3288_v0 = vld [vmem:[%s4402_s3 + $0xd0] ss:$8 sps:$4 sm:$0xff]  }
 0x1c5   :  { %1427 = vrot.lane.b32.xlu0 %v1407_v54, %s3460_s25 }
 0x1c7   :  { %2464 = vmatpush1.bf16.msra.mxu0 %v3339_v53  ;;  %v3296_v53 = vld [vmem:[%s4402_s3 + $0xc4] ss:$8 sps:$4 sm:$0xff]  }
 0x22b   :  { %v1416_v58 = vpop.permute.xlu1 %1415  ;;  %v1410_v32 = vpop.permute.xlu0 %1409 }
 0x22c   :  { %v1431_v2 = vsel %vm1430_vm2, %v1407_v54, %v1410_v32  ;;  %v3347_v54 = vld [vmem:[%s4402_s3 + $0x344] ss:$8 sps:$4 sm:$0xff]   ;;  %v3353_v32 = vld [vmem:[%s4402_s3 + $0x334] ss:$8 sps:$4 sm:$0xff]  }
 0x22d   :  { %2465 = vmatprep.subr.bf16.mxu0 %v3347_v54  ;;  %v3294_v54 = vld [vmem:[%s4402_s3 + $0xc0] ss:$8 sps:$4 sm:$0xff]  }
 0x22f   :  { %v1419_v5 = vpop.permute.xlu1 %1418  ;;  %v1413_v55 = vpop.permute.xlu0 %1412 }
 0x230   :  { %v1433_v1 = vsel %vm1432_vm3, %v1431_v2, %v1413_v55  ;;  %v3351_v2 = vld [vmem:[%s4402_s3 + $0x330] ss:$8 sps:$4 sm:$0xff]   ;;  %v3357_v55 = vld [vmem:[%s4402_s3 + $0x320] ss:$8 sps:$4 sm:$0xff]  }
 0x231   :  { %v1435_v4 = vsel %vm1434_vm4, %v1433_v1, %v1416_v58  ;;  %v3345_v58 = vld [vmem:[%s4402_s3 + $0x340] ss:$8 sps:$4 sm:$0xff]   ;;  %v3365_v1 = vld [vmem:[%s4402_s3 + $0x314] ss:$8 sps:$4 sm:$0xff]  }
 0x232   :  { %v1437_v56 = vsel %vm1436_vm5, %v1435_v4, %v1419_v5  ;;  %2466 = vmatpush1.bf16.msra.mxu0 %v3345_v58  ;;  %v3359_v5 = vld [vmem:[%s4402_s3 + $0x324] ss:$8 sps:$4 sm:$0xff]   ;;  %v3363_v4 = vld [vmem:[%s4402_s3 + $0x310] ss:$8 sps:$4 sm:$0xff]   ;;  %v3302_v58 = vld [vmem:[%s4402_s3 + $0xb4] ss:$8 sps:$4 sm:$0xff]  }
 0x233   :  { %v1422_v62 = vpop.permute.xlu0 %1421  ;;  %v1425_v8 = vpop.permute.xlu1 %1424  ;;  %2467 = vmatprep.subr.bf16.mxu0 %v3353_v32  ;;  %v3300_v32 = vld [vmem:[%s4402_s3 + $0xb0] ss:$8 sps:$4 sm:$0xff]  }
 0x234   :  { %v1439_v11 = vsel %vm1438_vm6, %v1437_v56, %v1422_v62  ;;  %v3371_v56 = vld [vmem:[%s4402_s3 + $0x304] ss:$8 sps:$4 sm:$0xff]  }
 0x235   :  { %v1441_v3 = vsel %vm1440_vm7, %v1439_v11, %v1425_v8  ;;  %v3369_v8 = vld [vmem:[%s4402_s3 + $0x300] ss:$8 sps:$4 sm:$0xff]   ;;  %v3377_v11 = vld [vmem:[%s4402_s3 + $0x3f4] ss:$8 sps:$4 sm:$0xff]  }
 0x236   :  { %2468 = vmatpush1.bf16.msra.mxu0 %v3351_v2  ;;  %v3308_v2 = vld [vmem:[%s4402_s3 + $0xa4] ss:$8 sps:$4 sm:$0xff]  }
 0x237   :  { %v1428_v17 = vpop.permute.xlu0 %1427  ;;  %2469 = vmatprep.subr.bf16.mxu0 %v3359_v5  ;;  %v3306_v5 = vld [vmem:[%s4402_s3 + $0xa0] ss:$8 sps:$4 sm:$0xff]  }
 0x238   :  { %v1443_v10 = vsel %vm1442_vm8, %v1441_v3, %v1428_v17  ;;  %v3375_v17 = vld [vmem:[%s4402_s3 + $0x3f0] ss:$8 sps:$4 sm:$0xff]   ;;  %v3383_v3 = vld [vmem:[%s4402_s3 + $0x3e4] ss:$8 sps:$4 sm:$0xff]  }
 0x239   :  { %v1445_v61 = vsel %vm1444_vm9, %v1443_v10, 0.0 }
 0x23a   :  { %1446 = vadd.xlane.f32.xlu1 %v1445_v61  ;;  %2470 = vmatpush1.bf16.msra.mxu0 %v3357_v55  ;;  %v3389_v61 = vld [vmem:[%s4402_s3 + $0x3d4] ss:$8 sps:$4 sm:$0xff]  }
 0x23b   :  { %2471 = vmatprep.subr.bf16.mxu0 %v3365_v1  ;;  %v3314_v55 = vld [vmem:[%s4402_s3 + $0x94] ss:$8 sps:$4 sm:$0xff]   ;;  %v3312_v1 = vld [vmem:[%s4402_s3 + $0x90] ss:$8 sps:$4 sm:$0xff]  }
 0x23e   :  { %2472 = vmatpush1.bf16.msra.mxu0 %v3363_v4  ;;  %v3320_v4 = vld [vmem:[%s4402_s3 + $0x84] ss:$8 sps:$4 sm:$0xff]  }
 0x23f   :  { %2473 = vmatprep.subr.bf16.mxu0 %v3371_v56  ;;  %v3318_v56 = vld [vmem:[%s4402_s3 + $0x80] ss:$8 sps:$4 sm:$0xff]  }
 0x242   :  { %2474 = vmatpush1.bf16.msra.mxu0 %v3369_v8  ;;  %v3326_v8 = vld [vmem:[%s4402_s3 + $0x274] ss:$8 sps:$4 sm:$0xff]  }
 0x243   :  { %2475 = vmatprep.subr.bf16.mxu0 %v3377_v11  ;;  %v1545_v11 = vld [vmem:[%s4401_s2 + $0x28] sm:$0xff] }
 0x246   :  { %2476 = vmatpush2.bf16.msra.mxu0 %v3375_v17 }
 0x247   :  { %2477 = vmatprep.subr.bf16.mxu0 %v3383_v3  ;;  %v3324_v3 = vld [vmem:[%s4402_s3 + $0x270] ss:$8 sps:$4 sm:$0xff]  }
 0x2c3   :  { %v1447_v9 = vpop.xlane.xlu1 %1446 }
 0x2c4   :  { %v1449_v16 = vmul.f32 0.0625, %v1447_v9  ;;  %v3387_v9 = vld [vmem:[%s4402_s3 + $0x3d0] ss:$8 sps:$4 sm:$0xff]  }
 0x2c6   :  { %v3968_v19 = vsub.f32 %v1443_v10, %v1449_v16  ;;  %v3381_v10 = vld [vmem:[%s4402_s3 + $0x3e0] ss:$8 sps:$4 sm:$0xff]  }
 0x2c7   :  { %2478 = vmatpush2.bf16.msra.mxu0 %v3381_v10  ;;  %v1553_v10 = vpack.c.bf16 %v1545_v11, %v1545_v11 }
 0x2c8   :  { %v1451_v14 = vmul.f32 %v3968_v19, %v3968_v19  ;;  %2479 = vmatprep.subr.bf16.mxu0 %v3389_v61  ;;  %v3332_v61 = vld [vmem:[%s4402_s3 + $0x264] ss:$8 sps:$4 sm:$0xff]  }
 0x2ca   :  { %v1452_v20 = vsel %vm1444_vm9, %v1451_v14, 0.0 }
 0x2cb   :  { %1453 = vadd.xlane.f32.xlu0 %v1452_v20  ;;  %2480 = vmatpush2.bf16.msra.mxu0 %v3387_v9  ;;  %v3395_v20 = vld [vmem:[%s4402_s3 + $0x3c4] ss:$8 sps:$4 sm:$0xff]   ;;  %v3330_v9 = vld [vmem:[%s4402_s3 + $0x260] ss:$8 sps:$4 sm:$0xff]  }
 0x2cc   :  { %2481 = vmatprep.subr.bf16.mxu0 %v3395_v20  ;;  %v3344_v20 = vld [vmem:[%s4402_s3 + $0x244] ss:$8 sps:$4 sm:$0xff]  }
 0x2cf   :  { %2482 = vmatpush2.bf16.msra.mxu0 %v3393_v21  ;;  %v3350_v21 = vld [vmem:[%s4402_s3 + $0x234] ss:$8 sps:$4 sm:$0xff]  }
 0x2d0   :  { %2483 = vmatprep.subr.bf16.mxu0 %v3401_v41  ;;  %v3362_v41 = vld [vmem:[%s4402_s3 + $0x214] ss:$8 sps:$4 sm:$0xff]  }
 0x2d3   :  { %2484 = vmatpush2.bf16.msra.mxu0 %v3399_v45  ;;  %v3360_v45 = vld [vmem:[%s4402_s3 + $0x210] ss:$8 sps:$4 sm:$0xff]  }
 0x2d4   :  { %2485 = vmatprep.subr.bf16.mxu0 %v3407_v37  ;;  %v3368_v37 = vld [vmem:[%s4402_s3 + $0x204] ss:$8 sps:$4 sm:$0xff]  }
 0x2d7   :  { %2486 = vmatpush2.bf16.msra.mxu0 %v3405_v18  ;;  %v3366_v18 = vld [vmem:[%s4402_s3 + $0x200] ss:$8 sps:$4 sm:$0xff]  }
 0x2d8   :  { %2487 = vmatprep.subr.bf16.mxu0 %v3413_v34  ;;  %v3374_v34 = vld [vmem:[%s4402_s3 + $0x2f4] ss:$8 sps:$4 sm:$0xff]  }
 0x2db   :  { %2488 = vmatpush2.bf16.msra.mxu0 %v3411_v25  ;;  %v3372_v25 = vld [vmem:[%s4402_s3 + $0x2f0] ss:$8 sps:$4 sm:$0xff]  }
 0x2dc   :  { %2489 = vmatprep.subr.bf16.mxu0 %v3419_v6  ;;  %v3380_v6 = vld [vmem:[%s4402_s3 + $0x2e4] ss:$8 sps:$4 sm:$0xff]  }
 0x2df   :  { %2490 = vmatpush2.bf16.msra.mxu0 %v3417_v35  ;;  %v3378_v35 = vld [vmem:[%s4402_s3 + $0x2e0] ss:$8 sps:$4 sm:$0xff]  }
 0x2e2   :  { %2492 = vmatmul.mubr.bf16.vlgmr.msra.gmra.mxu0 %v1554_v38  ;;  %v3402_v38 = vld [vmem:[%s4402_s3 + $0x2a0] ss:$8 sps:$4 sm:$0xff]  }
 0x354   :  { %v1454_v62 = vpop.xlane.xlu0 %1453 }
 0x355   :  { %3422 = vrsqrt.f32 %v1454_v62  ;;  %vm1457_vm11 = vcmp.eq.f32.partialorder %v1454_v62, inf  ;;  %v1460_v12 = vand.u32 2147483648, %v1454_v62  ;;  %vm1459_vm12 = vcmp.eq.f32.partialorder %v1454_v62, 0.0 }
 0x362   :  { %v3423_v16 = vpop.eup %3422 }
 0x363   :  { %v1456_v14 = vmul.f32 %v3423_v16, %v1454_v62  ;;  %v3338_v16 = vld [vmem:[%s4402_s3 + $0x254] ss:$8 sps:$4 sm:$0xff]  }
 0x365   :  { %v1458_v22 = vsel %vm1457_vm11, %v1454_v62, %v1456_v14  ;;  %v1540_v62 = vld [vmem:[%s4401_s2] sm:$0xff]  ;;  %v3336_v14 = vld [vmem:[%s4402_s3 + $0x250] ss:$8 sps:$4 sm:$0xff]  }
 0x366   :  { %v1461_v26 = vsel %vm1459_vm12, %v1460_v12, %v1458_v22  ;;  %v1548_v17 = vpack.c.bf16 %v1540_v62, %v1540_v62  ;;  %v3342_v12 = vld [vmem:[%s4402_s3 + $0x240] ss:$8 sps:$4 sm:$0xff]   ;;  %v3348_v22 = vld [vmem:[%s4402_s3 + $0x230] ss:$8 sps:$4 sm:$0xff]  }
 0x367   :  { %v1462_v27 = vadd.f32 1e-08, %v1461_v26  ;;  %v3356_v26 = vld [vmem:[%s4402_s3 + $0x224] ss:$8 sps:$4 sm:$0xff]  }
 0x369   :  { %3424 = vrcp.f32 %v1462_v27  ;;  %v3354_v27 = vld [vmem:[%s4402_s3 + $0x220] ss:$8 sps:$4 sm:$0xff]  }
 0x376   :  { %v3425_v42 = vpop.eup %3424 }
 0x377   :  { %v1464_v13 = vmul.f32 %v3425_v42, %v3968_v19  ;;  %v3234_v19 = vld [vmem:[%s4402_s3 + $0x60] ss:$8 sps:$4 sm:$0xff]   ;;  %v3384_v42 = vld [vmem:[%s4402_s3 + $0x2d0] ss:$8 sps:$4 sm:$0xff]  }
 0x379   :  { %3142 = vmatpush3.xpose.msk.msra.mxu1 %vm1444_vm9, %v1464_v13 }
 0x37a   :  { %2336 = vmatprep.subr.bf16.mxu1 %v3230_v40  ;;  %v3392_v40 = vld [vmem:[%s4402_s3 + $0x2c4] ss:$8 sps:$4 sm:$0xff]  }
 0x37c   :  { %3144 = vmatmul.mubr.msk.f32.vlgmr.msra.gmra.mxu1 %vm1444_vm9, %v1464_v13  ;;  %v3404_v13 = vld [vmem:[%s4402_s3 + $0x2a4] ss:$8 sps:$4 sm:$0xff]  }
 0x37d   :  { %2337 = vmatpush1.bf16.msra.mxu1 %v3228_v7  ;;  %2368 = vmatprep.mubr.bf16.mxu1 %v1549_v23  ;;  %v3410_v7 = vld [vmem:[%s4402_s3 + $0x294] ss:$8 sps:$4 sm:$0xff]   ;;  %v3408_v23 = vld [vmem:[%s4402_s3 + $0x290] ss:$8 sps:$4 sm:$0xff]  }
 0x37e   :  { %2338 = vmatprep.subr.bf16.mxu1 %v3236_v29  ;;  %v3416_v29 = vld [vmem:[%s4402_s3 + $0x284] ss:$8 sps:$4 sm:$0xff]  }
 0x381   :  { %2339 = vmatpush1.bf16.msra.mxu1 %v3234_v19  ;;  %v3414_v19 = vld [vmem:[%s4402_s3 + $0x280] ss:$8 sps:$4 sm:$0xff]  }
 0x382   :  { %2340 = vmatprep.subr.bf16.mxu1 %v3242_v30  ;;  %v1544_v30 = vld [vmem:[%s4401_s2 + $0x20] sm:$0xff] }
 0x385   :  { %2341 = vmatpush1.bf16.msra.mxu1 %v3240_v31  ;;  %v1552_v31 = vpack.c.bf16 %v1544_v30, %v1544_v30 }
 0x386   :  { %2342 = vmatprep.subr.bf16.mxu1 %v3248_v43  ;;  %v2411_v43 = vpop.f32.mrf.mxu0 }
 0x389   :  { %2343 = vmatpush1.bf16.msra.mxu1 %v3246_v48  ;;  %v2413_v48 = vpop.f32.mrf.mxu0 }
 0x38a   :  { %2344 = vmatprep.subr.bf16.mxu1 %v3254_v49 }
 0x38b   :  { %v2415_v49 = vpop.f32.mrf.mxu0 }
 0x38d   :  { %2345 = vmatpush1.bf16.msra.mxu1 %v3252_v33  ;;  %v2416_v33 = vpop.f32.mrf.mxu0 }
 0x38e   :  { %2346 = vmatprep.subr.bf16.mxu1 %v3260_v57 }
 0x391   :  { %2347 = vmatpush1.bf16.msra.mxu1 %v3258_v59 }
 0x392   :  { %2348 = vmatprep.subr.bf16.mxu1 %v3266_v51 }
 0x395   :  { %2349 = vmatpush1.bf16.msra.mxu1 %v3264_v39 }
 0x396   :  { %2350 = vmatprep.subr.bf16.mxu1 %v3272_v36 }
 0x399   :  { %2351 = vmatpush1.bf16.msra.mxu1 %v3270_v46 }
 0x39a   :  { %2352 = vmatprep.subr.bf16.mxu1 %v3278_v52 }
 0x39d   :  { %2353 = vmatpush2.bf16.msra.mxu1 %v3276_v47 }
 0x39e   :  { %2354 = vmatprep.subr.bf16.mxu1 %v3284_v60 }
 0x3a1   :  { %2355 = vmatpush2.bf16.msra.mxu1 %v3282_v44 }
 0x3a2   :  { %2356 = vmatprep.subr.bf16.mxu1 %v3290_v63  ;;  %v2493_v57 = vpop.f32.mrf.mxu0  ;;  %v1686_v63 = vlaneseq }
 0x3a4   :  { %v2495_v51 = vpop.f32.mrf.mxu0 }
 0x3a5   :  { %2357 = vmatpush2.bf16.msra.mxu1 %v3288_v0  ;;  %v1687_v0 = vshrl.u32 %v1686_v63, 7 }
 0x3a6   :  { %2358 = vmatprep.subr.bf16.mxu1 %v3296_v53  ;;  %v2497_v36 = vpop.f32.mrf.mxu0 }
 0x3a7   :  { %v1688_v53 = vsub.s32 0, %v1687_v0 }
 0x3a8   :  { %v2498_v46 = vpop.f32.mrf.mxu0 }
 0x3a9   :  { %2359 = vmatpush2.bf16.msra.mxu1 %v3294_v54  ;;  %v1684_v54 = vld [vmem:[%s4403_s4] sm:$0x3] }
 0x3aa   :  { %2360 = vmatprep.subr.bf16.mxu1 %v3302_v58  ;;  %v1692_v58 = vsub.s32 1, %v1687_v0 }
 0x3ad   :  { %2361 = vmatpush2.bf16.msra.mxu1 %v3300_v32  ;;  %v1689_v32 = vrot.slane %v1684_v54, %v1688_v53 }
 0x3ae   :  { %2362 = vmatprep.subr.bf16.mxu1 %v3308_v2  ;;  %v1693_v2 = vrot.slane %v1684_v54, %v1692_v58 }
 0x3b1   :  { %2363 = vmatpush2.bf16.msra.mxu1 %v3306_v5 }
 0x3b2   :  { %2364 = vmatprep.subr.bf16.mxu1 %v3314_v55 }
 0x3b5   :  { %2365 = vmatpush2.bf16.msra.mxu1 %v3312_v1 }
 0x3b6   :  { %2366 = vmatprep.subr.bf16.mxu1 %v3320_v4 }
 0x3b9   :  { %2367 = vmatpush2.bf16.msra.mxu1 %v3318_v56 }
 0x3ba   :  { %2418 = vmatprep.subr.bf16.mxu1 %v3326_v8 }
 0x3bc   :  { %2369 = vmatmul.mubr.bf16.vlgmr.msra.gmra.mxu1 %v1548_v17 }
 0x3bd   :  { %2419 = vmatpush1.bf16.msra.mxu1 %v3324_v3  ;;  %2450 = vmatprep.mubr.bf16.mxu1 %v1553_v10  ;;  %v2516_v3 = vld [vmem:[%s4404_s5 + $0x8] sm:$0xff] }
 0x3be   :  { %2420 = vmatprep.subr.bf16.mxu1 %v3332_v61 }
 0x3c1   :  { %2421 = vmatpush1.bf16.msra.mxu1 %v3330_v9 }
 0x3c2   :  { %2422 = vmatprep.subr.bf16.mxu1 %v3338_v16  ;;  %v2515_v16 = vld [vmem:[%s4404_s5] sm:$0xff]  ;;  %s3463_s5 = smov [#allocation2]  }
 0x3c5   :  { %2423 = vmatpush1.bf16.msra.mxu1 %v3336_v14 }
 0x3c6   :  { %2424 = vmatprep.subr.bf16.mxu1 %v3344_v20 }
 0x3c9   :  { %2425 = vmatpush1.bf16.msra.mxu1 %v3342_v12 }
 0x3ca   :  { %2426 = vmatprep.subr.bf16.mxu1 %v3350_v21 }
 0x3cd   :  { %2427 = vmatpush1.bf16.msra.mxu1 %v3348_v22 }
 0x3ce   :  { %2428 = vmatprep.subr.bf16.mxu1 %v3356_v26 }
 0x3d1   :  { %2429 = vmatpush1.bf16.msra.mxu1 %v3354_v27 }
 0x3d2   :  { %2430 = vmatprep.subr.bf16.mxu1 %v3362_v41 }
 0x3d5   :  { %2431 = vmatpush1.bf16.msra.mxu1 %v3360_v45 }
 0x3d6   :  { %2432 = vmatprep.subr.bf16.mxu1 %v3368_v37 }
 0x3d9   :  { %2433 = vmatpush1.bf16.msra.mxu1 %v3366_v18  ;;  %v2531_v18 = vld [vmem:[%s4405_s6] sm:$0xff]  ;;  %s2556_s6 = sshll.u32 %s3463_s5, 4  ;;  %s2557_s6 = int_to_ptr.vmem [resolvable:$true] %s2556_s6 }
 0x3da   :  { %2434 = vmatprep.subr.bf16.mxu1 %v3374_v34  ;;  %s3432_s28 = scalar_lea.vmem %s2557_s6, 16  ;;  %s3436_s29 = scalar_lea.vmem %s2557_s6, 32 }
 0x3db   :  { %p3433_p0 = scmp.ne.s32.totalorder %s2557_s6, %s3432_s28  ;;  %p3437_p1 = scmp.lt.s32.totalorder %s2557_s6, %s2557_s6 }
 0x3dc   :  { %p3438_p2 = scmp.lt.s32.totalorder %s3436_s29, %s3432_s28 }
 0x3dd   :  { %2435 = vmatpush2.bf16.msra.mxu1 %v3372_v25 }
 0x3de   :  { %2436 = vmatprep.subr.bf16.mxu1 %v3380_v6  ;;  %p3439_p3 = por %p3438_p2, %p3437_p1 }
 0x3e0   :  { %p3440_p4 = pnand %p3439_p3, %p3433_p0 }
 0x3e1   :  { %2437 = vmatpush2.bf16.msra.mxu1 %v3378_v35 }
 0x3e2   :  { %2438 = vmatprep.subr.bf16.mxu1 %v3386_v15 }
 0x3e5   :  { %2439 = vmatpush2.bf16.msra.mxu1 %v3384_v42 }
 0x3e6   :  { %2440 = vmatprep.subr.bf16.mxu1 %v3392_v40 }
 0x3e9   :  { %2441 = vmatpush2.bf16.msra.mxu1 %v3390_v24 }
 0x3ea   :  { %2442 = vmatprep.subr.bf16.mxu1 %v3398_v50 }
 0x3ed   :  { %2443 = vmatpush2.bf16.msra.mxu1 %v3396_v28 }
 0x3ee   :  { %2444 = vmatprep.subr.bf16.mxu1 %v3404_v13 }
 0x3f1   :  { %2445 = vmatpush2.bf16.msra.mxu1 %v3402_v38 }
 0x3f2   :  { %2446 = vmatprep.subr.bf16.mxu1 %v3410_v7 }
 0x3f5   :  { %2447 = vmatpush2.bf16.msra.mxu1 %v3408_v23 }
 0x3f6   :  { %2448 = vmatprep.subr.bf16.mxu1 %v3416_v29 }
 0x3f9   :  { %2449 = vmatpush2.bf16.msra.mxu1 %v3414_v19 }
 0x3fc   :  { %2451 = vmatmul.mubr.bf16.vlgmr.msra.gmra.mxu1 %v1552_v31 }
 0x43c   :  { %v1534_v59 = vpop.f32.mrf.mxu1 }
 0x43d   :  { %v2686_v37 = vclamps-f32 %v1534_v59, 1.0 }
 0x43e   :  { %v3145_v39 = vpop.f32.mrf.mxu1 }
 0x43f   :  { %v2532_v34 = vsub.f32 %v2686_v37, %v2531_v18 }
 0x441   :  { %v2533_v15 = vmul.f32 %v2532_v34, %v2532_v34 }
 0x443   :  { %v2535_v42 = vsel %vm2534_vm13, %v2533_v15, 0.0 }
 0x47c   :  { %v2370_v52 = vpop.f32.mrf.mxu1 }
 0x47d   :  { %v2371_v5 = vadd.f32 %v2370_v52, %v1689_v32 }
 0x47e   :  { %v2372_v47 = vpop.f32.mrf.mxu1 }
 0x47f   :  { %v2373_v55 = vadd.f32 %v2372_v47, %v1693_v2  ;;  %v2412_v1 = vadd.f32 %v2411_v43, %v2371_v5 }
 0x480   :  { %v2374_v60 = vpop.f32.mrf.mxu1 }
 0x481   :  { %v2414_v56 = vadd.f32 %v2413_v48, %v2373_v55 }
 0x482   :  { %v2375_v44 = vpop.f32.mrf.mxu1 }
 0x4bc   :  { %v2452_v4 = vpop.f32.mrf.mxu1 }
 0x4bd   :  { %v2453_v62 = vadd.f32 %v2452_v4, %v2412_v1 }
 0x4be   :  { %v2454_v8 = vpop.f32.mrf.mxu1 }
 0x4bf   :  { %v2455_v11 = vadd.f32 %v2454_v8, %v2414_v56  ;;  %v2494_v10 = vadd.f32 %v2493_v57, %v2453_v62 }
 0x4c0   :  { %v2456_v17 = vpop.f32.mrf.mxu1 }
 0x4c1   :  { %v2496_v61 = vadd.f32 %v2495_v51, %v2455_v11  ;;  %v2517_v12 = vmul.f32 %v2515_v16, %v2494_v10 }
 0x4c2   :  { %v2457_v9 = vpop.f32.mrf.mxu1 }
 0x4c3   :  { %v2500_v14 = vmax.f32 %v2494_v10, %v2496_v61  ;;  %v2518_v20 = vmul.f32 %v2516_v3, %v2496_v61 }
 0x4c5   :  { %2501 = vmax.xlane.f32.xlu0 %v2500_v14  ;;  %v2519_v21 = vadd.f32 %v2518_v20, %v2517_v12 }
 0x4c9   :  { %2520 = vadd.xlane.f32.xlu0 %v2519_v21 }
 0x54e   :  { %v2502_v22 = vpop.xlane.xlu0 %2501 }
 0x54f   :  { %v2503_v26 = vsub.f32 %v2494_v10, %v2502_v22  ;;  %v2504_v27 = vsub.f32 %v2496_v61, %v2502_v22 }
 0x551   :  { %v2505_v41 = vmul.f32 1.442695, %v2503_v26  ;;  %v2507_v45 = vmul.f32 1.442695, %v2504_v27 }
 0x552   :  { %v2521_v29 = vpop.xlane.xlu0 %2520 }
 0x553   :  { %3426 = vpow2.f32 %v2505_v41 }
 0x554   :  { %3428 = vpow2.f32 %v2507_v45 }
 0x560   :  { %v3427_v25 = vpop.eup %3426 }
 0x561   :  { %v3429_v6 = vpop.eup %3428 }
 0x562   :  { %v2509_v35 = vadd.f32 %v3429_v6, %v3427_v25 }
 0x564   :  { %2510 = vadd.xlane.f32.xlu1 %v2509_v35 }
 0x568   :  { %2536 = vadd.xlane.f32.xlu1 %v2535_v42 }
 0x5ed   :  { %v2511_v40 = vpop.xlane.xlu1 %2510 }
 0x5ee   :  { %3430 = vlog2.f32 %v2511_v40 }
 0x5f1   :  { %v2537_v24 = vpop.xlane.xlu1 %2536 }
 0x5f2   :  { %v2538_v50 = vrot.slane %v2537_v24, 4 }
 0x5f4   :  { %v2539_v28 = vadd.f32 %v2538_v50, %v2537_v24 }
 0x5f6   :  { %v2540_v7 = vrot.slane %v2539_v28, 2 }
 0x5f8   :  { %v2541_v30 = vadd.f32 %v2540_v7, %v2539_v28 }
 0x5fa   :  { %v2542_v48 = vrot.slane %v2541_v30, 1 }
 0x5fb   :  { %v3431_v13 = vpop.eup %3430 }
 0x5fc   :  { %v2513_v38 = vmul.f32 0.6931472, %v3431_v13  ;;  %v2543_v33 = vadd.f32 %v2542_v48, %v2541_v30 }
 0x5fe   :  { %v2514_v23 = vadd.f32 %v2513_v38, %v2502_v22  ;;  %v2544_v51 = vmul.f32 0.015625, %v2543_v33 }
 0x600   :  { %v2522_v19 = vsub.f32 %v2514_v23, %v2521_v29  ;;  %v2546_v46 = vmul.f32 0.99, %v2544_v51 }
 0x602   :  { %v2523_v31 = vrot.slane %v2522_v19, 4 }
 0x604   :  { %v2524_v43 = vadd.f32 %v2523_v31, %v2522_v19 }
 0x606   :  { %v2525_v49 = vrot.slane %v2524_v43, 2 }
 0x608   :  { %v2526_v57 = vadd.f32 %v2525_v49, %v2524_v43 }
 0x60a   :  { %v2527_v59 = vrot.slane %v2526_v57, 1 }
 0x60c   :  { %v2528_v39 = vadd.f32 %v2527_v59, %v2526_v57 }
 0x60e   :  { %v2530_v36 = vmul.f32 0.125, %v2528_v39 }
 0x610   :  { %v2545_v52 = vmul.f32 0.01, %v2530_v36 }
 0x612   :  { %v2547_v47 = vadd.f32 %v2546_v46, %v2545_v52 }
 0x614   :  { %2549 = vst.msk [vmem:[#allocation2] sm:$0x1] %vm2548_vm14, %v2547_v47 }
 0x615   :  { %3443 = shalt.err (!%p3440_p4)
}
 0x616   :  { %2559 = dma.vmem_to_hbm [thread:$0]  %s2557_s6, 16, %s4406_s7, [#allocation3]  }
 0x617   :  { %3452 = dma.done.wait [#allocation3], 16  }
 0x618   :  { %3453 = vsyncadd [#allocation3], 4294967280 }
 0x619   :  { %2563 = vsyncpa [#allocation3], 1 }

</bundles_post_ra>
